<compile_context>
chip_gen: v5e
topology: v5e:2x2
jax: 0.10.0
libtpu: 0.0.40
codegen_flags: <defaults>
</compile_context>

<pallas_src>
import functools

import jax
import jax.numpy as jnp
from jax import lax
from jax.experimental import pallas as pl
from jax.experimental.pallas import tpu as pltpu

SINUSOIDAL_TIME_EMBED_MAX_T = 500.0
LEAKY_SLOPE = 0.01          # nn.LeakyReLU default
BN_EPS = 1e-5               # nn.BatchNorm1d default
MXU_DTYPE = jnp.bfloat16    # dtype of matmul operands; accumulation stays f32


# ----------------------------- kernel helpers ------------------------------

def _leaky_relu(x):
    return jnp.where(x > 0, x, LEAKY_SLOPE * x)


def _batchnorm_train(x, gamma, beta, inv_n):
    # BatchNorm1d (training mode, biased var) — single pass: one sweep for both
    # sum(x) and sum(x*x); var = E[x^2] - mu^2, clamped to guard cancellation.
    s1 = jnp.sum(x, axis=0, keepdims=True)
    s2 = jnp.sum(x * x, axis=0, keepdims=True)
    mu = s1 * inv_n
    var = jnp.maximum(s2 * inv_n - mu * mu, 0.0)
    return (x - mu) * lax.rsqrt(var + BN_EPS) * gamma + beta


def _mxdot(a, b):
    # bf16 x bf16 MXU matmul with f32 accumulation (weights are already bf16).
    return jnp.dot(a.astype(MXU_DTYPE), b.astype(MXU_DTYPE),
                   preferred_element_type=jnp.float32)


# ------------------------------- fused kernel --------------------------------

def fused_gnn_kernel(*refs, layer_has_res):
    """Whole forward in one kernel:
       xh = x_embed(x) + time_mlp(sinusoid(t))
       for each layer:  xh = MLP(TAGConv_K2(LeakyReLU(BN(xh)), A)) + res(xh)
       out = Linear(xh)
    Everything (xh, A, all weights) stays resident in VMEM."""
    out_ref = refs[-1]
    it = iter(refs[:-1])

    x_ref = next(it)
    sin_ref = next(it)
    a_ref = next(it)                       # (N, N) bf16, read at each dot site
    wx = next(it); bx = next(it)
    wt1 = next(it); bt1 = next(it)
    wt2 = next(it); bt2 = next(it)

    inv_n = jnp.float32(1.0 / x_ref.shape[0])    # static N

    # Input embedding: x_embed(x) + SinusoidalTimeEmbedding.lin_embed(sinusoid(t)).
    xh = _mxdot(x_ref[...], wx[...]) + bx[...]
    te = _mxdot(sin_ref[...], wt1[...]) + bt1[...]
    te = _leaky_relu(te)
    te = _mxdot(te, wt2[...]) + bt2[...]
    xh = xh + te

    # Residual TAGConv layers (unrolled; depth is static).
    for has_res in layer_has_res:
        bn_g = next(it); bn_b = next(it)
        w0 = next(it); w1 = next(it); w2 = next(it); cb = next(it)
        mw1 = next(it); mb1 = next(it)
        mg = next(it); mb = next(it)
        mw2 = next(it); mb2 = next(it)
        if has_res:
            res_w = next(it); res_b = next(it)

        # NormLayer (norm='batch', training stats) + LeakyReLU; dropout p=0 is a no-op.
        h = _batchnorm_train(xh, bn_g[...], bn_b[...], inv_n)
        h = _leaky_relu(h)

        # TAGConv, K=2, normalize=False, bias=True — sum-of-dots hop mix (no lane-axis
        # concat, no (N, 3*cin) f32 materialization; f32 accumulation on the MXU path):
        #   c = h @ W0 + (A h) @ W1 + (A (A h)) @ W2 + bias
        h_mx = h.astype(MXU_DTYPE)
        h1 = jnp.dot(a_ref[...], h_mx, preferred_element_type=jnp.float32)
        h1_mx = h1.astype(MXU_DTYPE)
        h2 = jnp.dot(a_ref[...], h1_mx, preferred_element_type=jnp.float32)
        c = (jnp.dot(h_mx, w0[...], preferred_element_type=jnp.float32)
             + jnp.dot(h1_mx, w1[...], preferred_element_type=jnp.float32)
             + jnp.dot(h2.astype(MXU_DTYPE), w2[...], preferred_element_type=jnp.float32)
             + cb[...])

        # PyG MLP [h, 4h, h] (plain_last): Linear -> BatchNorm -> LeakyReLU -> Linear.
        z = _mxdot(c, mw1[...]) + mb1[...]
        z = _batchnorm_train(z, mg[...], mb[...], inv_n)
        z = _leaky_relu(z)
        z = _mxdot(z, mw2[...]) + mb2[...]

        # Residual connection: + Linear(xh) if channel count changes, else + xh.
        if has_res:
            xh = z + _mxdot(xh, res_w[...]) + res_b[...]
        else:
            xh = z + xh

    # Output Linear.
    w_out = next(it); b_out = next(it)
    out_ref[...] = _mxdot(xh, w_out[...]) + b_out[...]


# --------------------------- pallas_call wrapper -----------------------------

@functools.lru_cache(maxsize=None)
def _vmem_limit_bytes():
    # Generation-aware scoped-VMEM ceiling: ~80% of physical
    # (≈100 MiB on v5e/v6e's 128 MiB, ≈51 MiB on v7x's 64 MiB).
    try:
        cap = pltpu.get_tpu_info().vmem_capacity_bytes
    except Exception:
        cap = 128 << 20
    return int(cap * 4 // 5)


def _fused_call(layer_has_res, args, out_shape):
    vmem = pl.BlockSpec(memory_space=pltpu.MemorySpace.VMEM)
    return pl.pallas_call(
        functools.partial(fused_gnn_kernel, layer_has_res=tuple(layer_has_res)),
        out_shape=jax.ShapeDtypeStruct(out_shape, jnp.float32),
        in_specs=[vmem] * len(args),
        out_specs=vmem,
        compiler_params=pltpu.CompilerParams(vmem_limit_bytes=_vmem_limit_bytes()),
    )(*args)


# ------------------------------ parameters -----------------------------------

def init_params(key, in_channels, hidden_channels, depth):
    h = hidden_channels
    h4 = h // 4                       # x_embed / time-embed width
    half_dim = max(h4 // 8, 2)        # guard: sinusoid needs at least 2 freqs
    sin_dim = 2 * half_dim            # sinusoid feature width
    keys = iter(jax.random.split(key, 128))

    def xav(shape):                   # xavier_uniform, stored as (fan_in, fan_out)
        lim = (6.0 / (shape[0] + shape[1])) ** 0.5
        return jax.random.uniform(next(keys), shape, jnp.float32, -lim, lim)

    p = {
        "x_embed_w": xav((in_channels, h4)),
        "x_embed_b": jnp.zeros((1, h4), jnp.float32),
        "t_lin1_w": xav((sin_dim, h4)),
        "t_lin1_b": jnp.zeros((1, h4), jnp.float32),
        "t_lin2_w": xav((h4, h4)),
        "t_lin2_b": jnp.zeros((1, h4), jnp.float32),
        "out_w": xav((h, in_channels)),
        "out_b": jnp.zeros((1, in_channels), jnp.float32),
        "layers": [],
    }
    for layer in range(depth):
        cin = h4 if layer == 0 else h
        lp = dict(
            bn_g=jnp.ones((1, cin), jnp.float32),
            bn_b=jnp.zeros((1, cin), jnp.float32),
            # TAGConv hop weights kept split (sum-of-dots form in the kernel).
            w0=xav((cin, h)), w1=xav((cin, h)), w2=xav((cin, h)),
            cb=jnp.zeros((1, h), jnp.float32),
            mw1=xav((h, 4 * h)), mb1=jnp.zeros((1, 4 * h), jnp.float32),
            mg=jnp.ones((1, 4 * h), jnp.float32), mb=jnp.zeros((1, 4 * h), jnp.float32),
            mw2=xav((4 * h, h)), mb2=jnp.zeros((1, h), jnp.float32),
        )
        if cin != h:
            lp["res_w"] = xav((cin, h))
            lp["res_b"] = jnp.zeros((1, h), jnp.float32)   # nn.Linear default bias=True
        p["layers"].append(lp)
    return p


# -------------------------------- forward ------------------------------------

def residual_gnn_forward(params, x, edge_index, edge_weight, t):
    """Returns (out, attn_weights, debug_data) like ResidualGNN.forward."""
    N = x.shape[0]
    sin_dim = params["t_lin1_w"].shape[0]
    half_dim = sin_dim // 2

    # glue: densify graph -> A[dst, src] = sum of edge weights (TAGConv prop = A @ h).
    # Under jit, the scatter-add and the bf16 cast below fuse into one HBM write.
    A = jnp.zeros((N, N), jnp.float32).at[edge_index[1], edge_index[0]].add(edge_weight)

    # glue: sinusoidal time features (tiny elementwise; the time-MLP matmuls run in-kernel)
    freqs = jnp.exp(jnp.arange(half_dim, dtype=jnp.float32)
                    * -(jnp.log(jnp.float32(SINUSOIDAL_TIME_EMBED_MAX_T))
                        / max(half_dim - 1, 1)))
    emb = t * freqs[None, :]                                         # (N, half_dim)
    sinus = jnp.concatenate([jnp.sin(emb), jnp.cos(emb)], axis=-1)   # (N, 2*half_dim)

    def mx(w):  # host-side cast of matmul operands -> halves weight/A DMA traffic
        return w.astype(MXU_DTYPE)

    args = [x, sinus, mx(A),
            mx(params["x_embed_w"]), params["x_embed_b"],
            mx(params["t_lin1_w"]), params["t_lin1_b"],
            mx(params["t_lin2_w"]), params["t_lin2_b"]]
    layer_has_res = []
    for lp in params["layers"]:
        has_res = "res_w" in lp
        layer_has_res.append(has_res)
        args += [lp["bn_g"], lp["bn_b"],
                 mx(lp["w0"]), mx(lp["w1"]), mx(lp["w2"]), lp["cb"],
                 mx(lp["mw1"]), lp["mb1"], lp["mg"], lp["mb"],
                 mx(lp["mw2"]), lp["mb2"]]
        if has_res:
            args += [mx(lp["res_w"]), lp["res_b"]]
    args += [mx(params["out_w"]), params["out_b"]]

    out = _fused_call(layer_has_res, args, (N, params["out_w"].shape[1]))

    # TODO(synk): per-layer debug norm statistics (host-side .item() calls), running
    #             BatchNorm stats (eval-mode parity) and debug_data are not reproduced;
    #             they do not affect `out` when debug_forward_pass=False.
    return out, None, None


# --------------------------------- main ---------------------------------------

if __name__ == "__main__":
    in_channels, hidden_channels, depth = 4, 64, 2
    N, E = 16, 48

    key = jax.random.PRNGKey(0)
    k_x, k_t, k_ei, k_ew, k_p = jax.random.split(key, 5)

    x = jax.random.normal(k_x, (N, in_channels), jnp.float32)
    t = jax.random.uniform(k_t, (N, 1), jnp.float32, 0.0, SINUSOIDAL_TIME_EMBED_MAX_T)
    edge_index = jax.random.randint(k_ei, (2, E), 0, N, dtype=jnp.int32)
    edge_weight = jax.random.uniform(k_ew, (E,), jnp.float32, 0.1, 1.0)

    params = init_params(k_p, in_channels, hidden_channels, depth)

    fwd = jax.jit(residual_gnn_forward)
    out, attn_weights, debug_data = fwd(params, x, edge_index, edge_weight, t)
    out = jax.block_until_ready(out)

    assert out.shape == (N, in_channels) and out.dtype == jnp.float32
    assert bool(jnp.all(jnp.isfinite(out)))
    print("KERNEL_OK")
</pallas_src>

<mosaic_0001>
module attributes {stable_mosaic.version = 11 : i64} {
  func.func @fused_gnn_kernel(%arg0: memref<16x4xf32, #tpu.memory_space<vmem>>, %arg1: memref<16x4xf32, #tpu.memory_space<vmem>>, %arg2: memref<16x16xbf16, #tpu.memory_space<vmem>>, %arg3: memref<4x16xbf16, #tpu.memory_space<vmem>>, %arg4: memref<1x16xf32, #tpu.memory_space<vmem>>, %arg5: memref<4x16xbf16, #tpu.memory_space<vmem>>, %arg6: memref<1x16xf32, #tpu.memory_space<vmem>>, %arg7: memref<16x16xbf16, #tpu.memory_space<vmem>>, %arg8: memref<1x16xf32, #tpu.memory_space<vmem>>, %arg9: memref<1x16xf32, #tpu.memory_space<vmem>>, %arg10: memref<1x16xf32, #tpu.memory_space<vmem>>, %arg11: memref<16x64xbf16, #tpu.memory_space<vmem>>, %arg12: memref<16x64xbf16, #tpu.memory_space<vmem>>, %arg13: memref<16x64xbf16, #tpu.memory_space<vmem>>, %arg14: memref<1x64xf32, #tpu.memory_space<vmem>>, %arg15: memref<64x256xbf16, #tpu.memory_space<vmem>>, %arg16: memref<1x256xf32, #tpu.memory_space<vmem>>, %arg17: memref<1x256xf32, #tpu.memory_space<vmem>>, %arg18: memref<1x256xf32, #tpu.memory_space<vmem>>, %arg19: memref<256x64xbf16, #tpu.memory_space<vmem>>, %arg20: memref<1x64xf32, #tpu.memory_space<vmem>>, %arg21: memref<16x64xbf16, #tpu.memory_space<vmem>>, %arg22: memref<1x64xf32, #tpu.memory_space<vmem>>, %arg23: memref<1x64xf32, #tpu.memory_space<vmem>>, %arg24: memref<1x64xf32, #tpu.memory_space<vmem>>, %arg25: memref<64x64xbf16, #tpu.memory_space<vmem>>, %arg26: memref<64x64xbf16, #tpu.memory_space<vmem>>, %arg27: memref<64x64xbf16, #tpu.memory_space<vmem>>, %arg28: memref<1x64xf32, #tpu.memory_space<vmem>>, %arg29: memref<64x256xbf16, #tpu.memory_space<vmem>>, %arg30: memref<1x256xf32, #tpu.memory_space<vmem>>, %arg31: memref<1x256xf32, #tpu.memory_space<vmem>>, %arg32: memref<1x256xf32, #tpu.memory_space<vmem>>, %arg33: memref<256x64xbf16, #tpu.memory_space<vmem>>, %arg34: memref<1x64xf32, #tpu.memory_space<vmem>>, %arg35: memref<64x4xbf16, #tpu.memory_space<vmem>>, %arg36: memref<1x4xf32, #tpu.memory_space<vmem>>, %arg37: memref<16x4xf32, #tpu.memory_space<vmem>>) attributes {dimension_semantics = [], scalar_prefetch = 0 : i64, scratch_operands = 0 : i64, tpu.core_type = #tpu.core_type<tc>} {
    %c0 = arith.constant 0 : index
    %c0_0 = arith.constant 0 : index
    %0 = vector.load %arg0[%c0, %c0_0] : memref<16x4xf32, #tpu.memory_space<vmem>>, vector<16x4xf32>
    %c0_1 = arith.constant 0 : index
    %c0_2 = arith.constant 0 : index
    %1 = vector.load %arg3[%c0_1, %c0_2] : memref<4x16xbf16, #tpu.memory_space<vmem>>, vector<4x16xbf16>
    %2 = arith.truncf %0 : vector<16x4xf32> to vector<16x4xbf16>
    %cst = arith.constant dense<0.000000e+00> : vector<16x16xf32>
    %3 = tpu.matmul %2, %1, %cst {dimension_numbers = #tpu.dot_dimension_numbers<[1], [0], [0], [1], [0, 0, 1, 1], [], []>} : vector<16x4xbf16>, vector<4x16xbf16>, vector<16x16xf32> -> vector<16x16xf32>
    %c0_3 = arith.constant 0 : index
    %c0_4 = arith.constant 0 : index
    %4 = vector.load %arg4[%c0_3, %c0_4] : memref<1x16xf32, #tpu.memory_space<vmem>>, vector<1x16xf32>
    %5 = vector.broadcast %4 : vector<1x16xf32> to vector<16x16xf32>
    %6 = arith.addf %3, %5 : vector<16x16xf32>
    %c0_5 = arith.constant 0 : index
    %c0_6 = arith.constant 0 : index
    %7 = vector.load %arg1[%c0_5, %c0_6] : memref<16x4xf32, #tpu.memory_space<vmem>>, vector<16x4xf32>
    %c0_7 = arith.constant 0 : index
    %c0_8 = arith.constant 0 : index
    %8 = vector.load %arg5[%c0_7, %c0_8] : memref<4x16xbf16, #tpu.memory_space<vmem>>, vector<4x16xbf16>
    %9 = arith.truncf %7 : vector<16x4xf32> to vector<16x4xbf16>
    %cst_9 = arith.constant dense<0.000000e+00> : vector<16x16xf32>
    %10 = tpu.matmul %9, %8, %cst_9 {dimension_numbers = #tpu.dot_dimension_numbers<[1], [0], [0], [1], [0, 0, 1, 1], [], []>} : vector<16x4xbf16>, vector<4x16xbf16>, vector<16x16xf32> -> vector<16x16xf32>
    %c0_10 = arith.constant 0 : index
    %c0_11 = arith.constant 0 : index
    %11 = vector.load %arg6[%c0_10, %c0_11] : memref<1x16xf32, #tpu.memory_space<vmem>>, vector<1x16xf32>
    %12 = vector.broadcast %11 : vector<1x16xf32> to vector<16x16xf32>
    %13 = arith.addf %10, %12 : vector<16x16xf32>
    %cst_12 = arith.constant 0.000000e+00 : f32
    %14 = vector.broadcast %cst_12 : f32 to vector<16x16xf32>
    %15 = arith.cmpf ogt, %13, %14 : vector<16x16xf32>
    %cst_13 = arith.constant 0.00999999977 : f32
    %16 = vector.broadcast %cst_13 : f32 to vector<16x16xf32>
    %17 = arith.mulf %16, %13 : vector<16x16xf32>
    %18 = arith.select %15, %13, %17 : vector<16x16xi1>, vector<16x16xf32>
    %c0_14 = arith.constant 0 : index
    %c0_15 = arith.constant 0 : index
    %19 = vector.load %arg7[%c0_14, %c0_15] : memref<16x16xbf16, #tpu.memory_space<vmem>>, vector<16x16xbf16>
    %20 = arith.truncf %18 : vector<16x16xf32> to vector<16x16xbf16>
    %cst_16 = arith.constant dense<0.000000e+00> : vector<16x16xf32>
    %21 = tpu.matmul %20, %19, %cst_16 {dimension_numbers = #tpu.dot_dimension_numbers<[1], [0], [0], [1], [0, 0, 1, 1], [], []>} : vector<16x16xbf16>, vector<16x16xbf16>, vector<16x16xf32> -> vector<16x16xf32>
    %c0_17 = arith.constant 0 : index
    %c0_18 = arith.constant 0 : index
    %22 = vector.load %arg8[%c0_17, %c0_18] : memref<1x16xf32, #tpu.memory_space<vmem>>, vector<1x16xf32>
    %23 = vector.broadcast %22 : vector<1x16xf32> to vector<16x16xf32>
    %24 = arith.addf %21, %23 : vector<16x16xf32>
    %25 = arith.addf %6, %24 : vector<16x16xf32>
    %c0_19 = arith.constant 0 : index
    %c0_20 = arith.constant 0 : index
    %26 = vector.load %arg9[%c0_19, %c0_20] : memref<1x16xf32, #tpu.memory_space<vmem>>, vector<1x16xf32>
    %c0_21 = arith.constant 0 : index
    %c0_22 = arith.constant 0 : index
    %27 = vector.load %arg10[%c0_21, %c0_22] : memref<1x16xf32, #tpu.memory_space<vmem>>, vector<1x16xf32>
    %cst_23 = arith.constant dense<0.000000e+00> : vector<16xf32>
    %28 = vector.multi_reduction <add>, %25, %cst_23 [0] : vector<16x16xf32> to vector<16xf32>
    %29 = vector.shape_cast %28 : vector<16xf32> to vector<1x16xf32>
    %30 = arith.mulf %25, %25 : vector<16x16xf32>
    %cst_24 = arith.constant dense<0.000000e+00> : vector<16xf32>
    %31 = vector.multi_reduction <add>, %30, %cst_24 [0] : vector<16x16xf32> to vector<16xf32>
    %32 = vector.shape_cast %31 : vector<16xf32> to vector<1x16xf32>
    %cst_25 = arith.constant 6.250000e-02 : f32
    %33 = vector.broadcast %cst_25 : f32 to vector<1x16xf32>
    %34 = arith.mulf %29, %33 : vector<1x16xf32>
    %cst_26 = arith.constant 6.250000e-02 : f32
    %35 = vector.broadcast %cst_26 : f32 to vector<1x16xf32>
    %36 = arith.mulf %32, %35 : vector<1x16xf32>
    %37 = arith.mulf %34, %34 : vector<1x16xf32>
    %38 = arith.subf %36, %37 : vector<1x16xf32>
    %cst_27 = arith.constant 0.000000e+00 : f32
    %39 = vector.broadcast %cst_27 : f32 to vector<1x16xf32>
    %40 = arith.maximumf %38, %39 : vector<1x16xf32>
    %41 = vector.broadcast %34 : vector<1x16xf32> to vector<16x16xf32>
    %42 = arith.subf %25, %41 : vector<16x16xf32>
    %cst_28 = arith.constant 9.99999974E-6 : f32
    %43 = vector.broadcast %cst_28 : f32 to vector<1x16xf32>
    %44 = arith.addf %40, %43 : vector<1x16xf32>
    %45 = math.rsqrt %44 : vector<1x16xf32>
    %46 = vector.broadcast %45 : vector<1x16xf32> to vector<16x16xf32>
    %47 = arith.mulf %42, %46 : vector<16x16xf32>
    %48 = vector.broadcast %26 : vector<1x16xf32> to vector<16x16xf32>
    %49 = arith.mulf %47, %48 : vector<16x16xf32>
    %50 = vector.broadcast %27 : vector<1x16xf32> to vector<16x16xf32>
    %51 = arith.addf %49, %50 : vector<16x16xf32>
    %cst_29 = arith.constant 0.000000e+00 : f32
    %52 = vector.broadcast %cst_29 : f32 to vector<16x16xf32>
    %53 = arith.cmpf ogt, %51, %52 : vector<16x16xf32>
    %cst_30 = arith.constant 0.00999999977 : f32
    %54 = vector.broadcast %cst_30 : f32 to vector<16x16xf32>
    %55 = arith.mulf %54, %51 : vector<16x16xf32>
    %56 = arith.select %53, %51, %55 : vector<16x16xi1>, vector<16x16xf32>
    %57 = arith.truncf %56 : vector<16x16xf32> to vector<16x16xbf16>
    %c0_31 = arith.constant 0 : index
    %c0_32 = arith.constant 0 : index
    %58 = vector.load %arg2[%c0_31, %c0_32] : memref<16x16xbf16, #tpu.memory_space<vmem>>, vector<16x16xbf16>
    %cst_33 = arith.constant dense<0.000000e+00> : vector<16x16xf32>
    %59 = tpu.matmul %58, %57, %cst_33 {dimension_numbers = #tpu.dot_dimension_numbers<[1], [0], [0], [1], [0, 0, 1, 1], [], []>} : vector<16x16xbf16>, vector<16x16xbf16>, vector<16x16xf32> -> vector<16x16xf32>
    %60 = arith.truncf %59 : vector<16x16xf32> to vector<16x16xbf16>
    %c0_34 = arith.constant 0 : index
    %c0_35 = arith.constant 0 : index
    %61 = vector.load %arg2[%c0_34, %c0_35] : memref<16x16xbf16, #tpu.memory_space<vmem>>, vector<16x16xbf16>
    %cst_36 = arith.constant dense<0.000000e+00> : vector<16x16xf32>
    %62 = tpu.matmul %61, %60, %cst_36 {dimension_numbers = #tpu.dot_dimension_numbers<[1], [0], [0], [1], [0, 0, 1, 1], [], []>} : vector<16x16xbf16>, vector<16x16xbf16>, vector<16x16xf32> -> vector<16x16xf32>
    %c0_37 = arith.constant 0 : index
    %c0_38 = arith.constant 0 : index
    %63 = vector.load %arg11[%c0_37, %c0_38] : memref<16x64xbf16, #tpu.memory_space<vmem>>, vector<16x64xbf16>
    %cst_39 = arith.constant dense<0.000000e+00> : vector<16x64xf32>
    %64 = tpu.matmul %57, %63, %cst_39 {dimension_numbers = #tpu.dot_dimension_numbers<[1], [0], [0], [1], [0, 0, 1, 1], [], []>} : vector<16x16xbf16>, vector<16x64xbf16>, vector<16x64xf32> -> vector<16x64xf32>
    %c0_40 = arith.constant 0 : index
    %c0_41 = arith.constant 0 : index
    %65 = vector.load %arg12[%c0_40, %c0_41] : memref<16x64xbf16, #tpu.memory_space<vmem>>, vector<16x64xbf16>
    %cst_42 = arith.constant dense<0.000000e+00> : vector<16x64xf32>
    %66 = tpu.matmul %60, %65, %cst_42 {dimension_numbers = #tpu.dot_dimension_numbers<[1], [0], [0], [1], [0, 0, 1, 1], [], []>} : vector<16x16xbf16>, vector<16x64xbf16>, vector<16x64xf32> -> vector<16x64xf32>
    %67 = arith.addf %64, %66 : vector<16x64xf32>
    %68 = arith.truncf %62 : vector<16x16xf32> to vector<16x16xbf16>
    %c0_43 = arith.constant 0 : index
    %c0_44 = arith.constant 0 : index
    %69 = vector.load %arg13[%c0_43, %c0_44] : memref<16x64xbf16, #tpu.memory_space<vmem>>, vector<16x64xbf16>
    %cst_45 = arith.constant dense<0.000000e+00> : vector<16x64xf32>
    %70 = tpu.matmul %68, %69, %cst_45 {dimension_numbers = #tpu.dot_dimension_numbers<[1], [0], [0], [1], [0, 0, 1, 1], [], []>} : vector<16x16xbf16>, vector<16x64xbf16>, vector<16x64xf32> -> vector<16x64xf32>
    %71 = arith.addf %67, %70 : vector<16x64xf32>
    %c0_46 = arith.constant 0 : index
    %c0_47 = arith.constant 0 : index
    %72 = vector.load %arg14[%c0_46, %c0_47] : memref<1x64xf32, #tpu.memory_space<vmem>>, vector<1x64xf32>
    %73 = vector.broadcast %72 : vector<1x64xf32> to vector<16x64xf32>
    %74 = arith.addf %71, %73 : vector<16x64xf32>
    %c0_48 = arith.constant 0 : index
    %c0_49 = arith.constant 0 : index
    %75 = vector.load %arg15[%c0_48, %c0_49] : memref<64x256xbf16, #tpu.memory_space<vmem>>, vector<64x256xbf16>
    %76 = arith.truncf %74 : vector<16x64xf32> to vector<16x64xbf16>
    %cst_50 = arith.constant dense<0.000000e+00> : vector<16x256xf32>
    %77 = tpu.matmul %76, %75, %cst_50 {dimension_numbers = #tpu.dot_dimension_numbers<[1], [0], [0], [1], [0, 0, 1, 1], [], []>} : vector<16x64xbf16>, vector<64x256xbf16>, vector<16x256xf32> -> vector<16x256xf32>
    %c0_51 = arith.constant 0 : index
    %c0_52 = arith.constant 0 : index
    %78 = vector.load %arg16[%c0_51, %c0_52] : memref<1x256xf32, #tpu.memory_space<vmem>>, vector<1x256xf32>
    %79 = vector.broadcast %78 : vector<1x256xf32> to vector<16x256xf32>
    %80 = arith.addf %77, %79 : vector<16x256xf32>
    %c0_53 = arith.constant 0 : index
    %c0_54 = arith.constant 0 : index
    %81 = vector.load %arg17[%c0_53, %c0_54] : memref<1x256xf32, #tpu.memory_space<vmem>>, vector<1x256xf32>
    %c0_55 = arith.constant 0 : index
    %c0_56 = arith.constant 0 : index
    %82 = vector.load %arg18[%c0_55, %c0_56] : memref<1x256xf32, #tpu.memory_space<vmem>>, vector<1x256xf32>
    %cst_57 = arith.constant dense<0.000000e+00> : vector<256xf32>
    %83 = vector.multi_reduction <add>, %80, %cst_57 [0] : vector<16x256xf32> to vector<256xf32>
    %84 = vector.shape_cast %83 : vector<256xf32> to vector<1x256xf32>
    %85 = arith.mulf %80, %80 : vector<16x256xf32>
    %cst_58 = arith.constant dense<0.000000e+00> : vector<256xf32>
    %86 = vector.multi_reduction <add>, %85, %cst_58 [0] : vector<16x256xf32> to vector<256xf32>
    %87 = vector.shape_cast %86 : vector<256xf32> to vector<1x256xf32>
    %cst_59 = arith.constant 6.250000e-02 : f32
    %88 = vector.broadcast %cst_59 : f32 to vector<1x256xf32>
    %89 = arith.mulf %84, %88 : vector<1x256xf32>
    %cst_60 = arith.constant 6.250000e-02 : f32
    %90 = vector.broadcast %cst_60 : f32 to vector<1x256xf32>
    %91 = arith.mulf %87, %90 : vector<1x256xf32>
    %92 = arith.mulf %89, %89 : vector<1x256xf32>
    %93 = arith.subf %91, %92 : vector<1x256xf32>
    %cst_61 = arith.constant 0.000000e+00 : f32
    %94 = vector.broadcast %cst_61 : f32 to vector<1x256xf32>
    %95 = arith.maximumf %93, %94 : vector<1x256xf32>
    %96 = vector.broadcast %89 : vector<1x256xf32> to vector<16x256xf32>
    %97 = arith.subf %80, %96 : vector<16x256xf32>
    %cst_62 = arith.constant 9.99999974E-6 : f32
    %98 = vector.broadcast %cst_62 : f32 to vector<1x256xf32>
    %99 = arith.addf %95, %98 : vector<1x256xf32>
    %100 = math.rsqrt %99 : vector<1x256xf32>
    %101 = vector.broadcast %100 : vector<1x256xf32> to vector<16x256xf32>
    %102 = arith.mulf %97, %101 : vector<16x256xf32>
    %103 = vector.broadcast %81 : vector<1x256xf32> to vector<16x256xf32>
    %104 = arith.mulf %102, %103 : vector<16x256xf32>
    %105 = vector.broadcast %82 : vector<1x256xf32> to vector<16x256xf32>
    %106 = arith.addf %104, %105 : vector<16x256xf32>
    %cst_63 = arith.constant 0.000000e+00 : f32
    %107 = vector.broadcast %cst_63 : f32 to vector<16x256xf32>
    %108 = arith.cmpf ogt, %106, %107 : vector<16x256xf32>
    %cst_64 = arith.constant 0.00999999977 : f32
    %109 = vector.broadcast %cst_64 : f32 to vector<16x256xf32>
    %110 = arith.mulf %109, %106 : vector<16x256xf32>
    %111 = arith.select %108, %106, %110 : vector<16x256xi1>, vector<16x256xf32>
    %c0_65 = arith.constant 0 : index
    %c0_66 = arith.constant 0 : index
    %112 = vector.load %arg19[%c0_65, %c0_66] : memref<256x64xbf16, #tpu.memory_space<vmem>>, vector<256x64xbf16>
    %113 = arith.truncf %111 : vector<16x256xf32> to vector<16x256xbf16>
    %cst_67 = arith.constant dense<0.000000e+00> : vector<16x64xf32>
    %114 = tpu.matmul %113, %112, %cst_67 {dimension_numbers = #tpu.dot_dimension_numbers<[1], [0], [0], [1], [0, 0, 1, 1], [], []>} : vector<16x256xbf16>, vector<256x64xbf16>, vector<16x64xf32> -> vector<16x64xf32>
    %c0_68 = arith.constant 0 : index
    %c0_69 = arith.constant 0 : index
    %115 = vector.load %arg20[%c0_68, %c0_69] : memref<1x64xf32, #tpu.memory_space<vmem>>, vector<1x64xf32>
    %116 = vector.broadcast %115 : vector<1x64xf32> to vector<16x64xf32>
    %117 = arith.addf %114, %116 : vector<16x64xf32>
    %c0_70 = arith.constant 0 : index
    %c0_71 = arith.constant 0 : index
    %118 = vector.load %arg21[%c0_70, %c0_71] : memref<16x64xbf16, #tpu.memory_space<vmem>>, vector<16x64xbf16>
    %119 = arith.truncf %25 : vector<16x16xf32> to vector<16x16xbf16>
    %cst_72 = arith.constant dense<0.000000e+00> : vector<16x64xf32>
    %120 = tpu.matmul %119, %118, %cst_72 {dimension_numbers = #tpu.dot_dimension_numbers<[1], [0], [0], [1], [0, 0, 1, 1], [], []>} : vector<16x16xbf16>, vector<16x64xbf16>, vector<16x64xf32> -> vector<16x64xf32>
    %121 = arith.addf %117, %120 : vector<16x64xf32>
    %c0_73 = arith.constant 0 : index
    %c0_74 = arith.constant 0 : index
    %122 = vector.load %arg22[%c0_73, %c0_74] : memref<1x64xf32, #tpu.memory_space<vmem>>, vector<1x64xf32>
    %123 = vector.broadcast %122 : vector<1x64xf32> to vector<16x64xf32>
    %124 = arith.addf %121, %123 : vector<16x64xf32>
    %c0_75 = arith.constant 0 : index
    %c0_76 = arith.constant 0 : index
    %125 = vector.load %arg23[%c0_75, %c0_76] : memref<1x64xf32, #tpu.memory_space<vmem>>, vector<1x64xf32>
    %c0_77 = arith.constant 0 : index
    %c0_78 = arith.constant 0 : index
    %126 = vector.load %arg24[%c0_77, %c0_78] : memref<1x64xf32, #tpu.memory_space<vmem>>, vector<1x64xf32>
    %cst_79 = arith.constant dense<0.000000e+00> : vector<64xf32>
    %127 = vector.multi_reduction <add>, %124, %cst_79 [0] : vector<16x64xf32> to vector<64xf32>
    %128 = vector.shape_cast %127 : vector<64xf32> to vector<1x64xf32>
    %129 = arith.mulf %124, %124 : vector<16x64xf32>
    %cst_80 = arith.constant dense<0.000000e+00> : vector<64xf32>
    %130 = vector.multi_reduction <add>, %129, %cst_80 [0] : vector<16x64xf32> to vector<64xf32>
    %131 = vector.shape_cast %130 : vector<64xf32> to vector<1x64xf32>
    %cst_81 = arith.constant 6.250000e-02 : f32
    %132 = vector.broadcast %cst_81 : f32 to vector<1x64xf32>
    %133 = arith.mulf %128, %132 : vector<1x64xf32>
    %cst_82 = arith.constant 6.250000e-02 : f32
    %134 = vector.broadcast %cst_82 : f32 to vector<1x64xf32>
    %135 = arith.mulf %131, %134 : vector<1x64xf32>
    %136 = arith.mulf %133, %133 : vector<1x64xf32>
    %137 = arith.subf %135, %136 : vector<1x64xf32>
    %cst_83 = arith.constant 0.000000e+00 : f32
    %138 = vector.broadcast %cst_83 : f32 to vector<1x64xf32>
    %139 = arith.maximumf %137, %138 : vector<1x64xf32>
    %140 = vector.broadcast %133 : vector<1x64xf32> to vector<16x64xf32>
    %141 = arith.subf %124, %140 : vector<16x64xf32>
    %cst_84 = arith.constant 9.99999974E-6 : f32
    %142 = vector.broadcast %cst_84 : f32 to vector<1x64xf32>
    %143 = arith.addf %139, %142 : vector<1x64xf32>
    %144 = math.rsqrt %143 : vector<1x64xf32>
    %145 = vector.broadcast %144 : vector<1x64xf32> to vector<16x64xf32>
    %146 = arith.mulf %141, %145 : vector<16x64xf32>
    %147 = vector.broadcast %125 : vector<1x64xf32> to vector<16x64xf32>
    %148 = arith.mulf %146, %147 : vector<16x64xf32>
    %149 = vector.broadcast %126 : vector<1x64xf32> to vector<16x64xf32>
    %150 = arith.addf %148, %149 : vector<16x64xf32>
    %cst_85 = arith.constant 0.000000e+00 : f32
    %151 = vector.broadcast %cst_85 : f32 to vector<16x64xf32>
    %152 = arith.cmpf ogt, %150, %151 : vector<16x64xf32>
    %cst_86 = arith.constant 0.00999999977 : f32
    %153 = vector.broadcast %cst_86 : f32 to vector<16x64xf32>
    %154 = arith.mulf %153, %150 : vector<16x64xf32>
    %155 = arith.select %152, %150, %154 : vector<16x64xi1>, vector<16x64xf32>
    %156 = arith.truncf %155 : vector<16x64xf32> to vector<16x64xbf16>
    %c0_87 = arith.constant 0 : index
    %c0_88 = arith.constant 0 : index
    %157 = vector.load %arg2[%c0_87, %c0_88] : memref<16x16xbf16, #tpu.memory_space<vmem>>, vector<16x16xbf16>
    %cst_89 = arith.constant dense<0.000000e+00> : vector<16x64xf32>
    %158 = tpu.matmul %157, %156, %cst_89 {dimension_numbers = #tpu.dot_dimension_numbers<[1], [0], [0], [1], [0, 0, 1, 1], [], []>} : vector<16x16xbf16>, vector<16x64xbf16>, vector<16x64xf32> -> vector<16x64xf32>
    %159 = arith.truncf %158 : vector<16x64xf32> to vector<16x64xbf16>
    %c0_90 = arith.constant 0 : index
    %c0_91 = arith.constant 0 : index
    %160 = vector.load %arg2[%c0_90, %c0_91] : memref<16x16xbf16, #tpu.memory_space<vmem>>, vector<16x16xbf16>
    %cst_92 = arith.constant dense<0.000000e+00> : vector<16x64xf32>
    %161 = tpu.matmul %160, %159, %cst_92 {dimension_numbers = #tpu.dot_dimension_numbers<[1], [0], [0], [1], [0, 0, 1, 1], [], []>} : vector<16x16xbf16>, vector<16x64xbf16>, vector<16x64xf32> -> vector<16x64xf32>
    %c0_93 = arith.constant 0 : index
    %c0_94 = arith.constant 0 : index
    %162 = vector.load %arg25[%c0_93, %c0_94] : memref<64x64xbf16, #tpu.memory_space<vmem>>, vector<64x64xbf16>
    %cst_95 = arith.constant dense<0.000000e+00> : vector<16x64xf32>
    %163 = tpu.matmul %156, %162, %cst_95 {dimension_numbers = #tpu.dot_dimension_numbers<[1], [0], [0], [1], [0, 0, 1, 1], [], []>} : vector<16x64xbf16>, vector<64x64xbf16>, vector<16x64xf32> -> vector<16x64xf32>
    %c0_96 = arith.constant 0 : index
    %c0_97 = arith.constant 0 : index
    %164 = vector.load %arg26[%c0_96, %c0_97] : memref<64x64xbf16, #tpu.memory_space<vmem>>, vector<64x64xbf16>
    %cst_98 = arith.constant dense<0.000000e+00> : vector<16x64xf32>
    %165 = tpu.matmul %159, %164, %cst_98 {dimension_numbers = #tpu.dot_dimension_numbers<[1], [0], [0], [1], [0, 0, 1, 1], [], []>} : vector<16x64xbf16>, vector<64x64xbf16>, vector<16x64xf32> -> vector<16x64xf32>
    %166 = arith.addf %163, %165 : vector<16x64xf32>
    %167 = arith.truncf %161 : vector<16x64xf32> to vector<16x64xbf16>
    %c0_99 = arith.constant 0 : index
    %c0_100 = arith.constant 0 : index
    %168 = vector.load %arg27[%c0_99, %c0_100] : memref<64x64xbf16, #tpu.memory_space<vmem>>, vector<64x64xbf16>
    %cst_101 = arith.constant dense<0.000000e+00> : vector<16x64xf32>
    %169 = tpu.matmul %167, %168, %cst_101 {dimension_numbers = #tpu.dot_dimension_numbers<[1], [0], [0], [1], [0, 0, 1, 1], [], []>} : vector<16x64xbf16>, vector<64x64xbf16>, vector<16x64xf32> -> vector<16x64xf32>
    %170 = arith.addf %166, %169 : vector<16x64xf32>
    %c0_102 = arith.constant 0 : index
    %c0_103 = arith.constant 0 : index
    %171 = vector.load %arg28[%c0_102, %c0_103] : memref<1x64xf32, #tpu.memory_space<vmem>>, vector<1x64xf32>
    %172 = vector.broadcast %171 : vector<1x64xf32> to vector<16x64xf32>
    %173 = arith.addf %170, %172 : vector<16x64xf32>
    %c0_104 = arith.constant 0 : index
    %c0_105 = arith.constant 0 : index
    %174 = vector.load %arg29[%c0_104, %c0_105] : memref<64x256xbf16, #tpu.memory_space<vmem>>, vector<64x256xbf16>
    %175 = arith.truncf %173 : vector<16x64xf32> to vector<16x64xbf16>
    %cst_106 = arith.constant dense<0.000000e+00> : vector<16x256xf32>
    %176 = tpu.matmul %175, %174, %cst_106 {dimension_numbers = #tpu.dot_dimension_numbers<[1], [0], [0], [1], [0, 0, 1, 1], [], []>} : vector<16x64xbf16>, vector<64x256xbf16>, vector<16x256xf32> -> vector<16x256xf32>
    %c0_107 = arith.constant 0 : index
    %c0_108 = arith.constant 0 : index
    %177 = vector.load %arg30[%c0_107, %c0_108] : memref<1x256xf32, #tpu.memory_space<vmem>>, vector<1x256xf32>
    %178 = vector.broadcast %177 : vector<1x256xf32> to vector<16x256xf32>
    %179 = arith.addf %176, %178 : vector<16x256xf32>
    %c0_109 = arith.constant 0 : index
    %c0_110 = arith.constant 0 : index
    %180 = vector.load %arg31[%c0_109, %c0_110] : memref<1x256xf32, #tpu.memory_space<vmem>>, vector<1x256xf32>
    %c0_111 = arith.constant 0 : index
    %c0_112 = arith.constant 0 : index
    %181 = vector.load %arg32[%c0_111, %c0_112] : memref<1x256xf32, #tpu.memory_space<vmem>>, vector<1x256xf32>
    %cst_113 = arith.constant dense<0.000000e+00> : vector<256xf32>
    %182 = vector.multi_reduction <add>, %179, %cst_113 [0] : vector<16x256xf32> to vector<256xf32>
    %183 = vector.shape_cast %182 : vector<256xf32> to vector<1x256xf32>
    %184 = arith.mulf %179, %179 : vector<16x256xf32>
    %cst_114 = arith.constant dense<0.000000e+00> : vector<256xf32>
    %185 = vector.multi_reduction <add>, %184, %cst_114 [0] : vector<16x256xf32> to vector<256xf32>
    %186 = vector.shape_cast %185 : vector<256xf32> to vector<1x256xf32>
    %cst_115 = arith.constant 6.250000e-02 : f32
    %187 = vector.broadcast %cst_115 : f32 to vector<1x256xf32>
    %188 = arith.mulf %183, %187 : vector<1x256xf32>
    %cst_116 = arith.constant 6.250000e-02 : f32
    %189 = vector.broadcast %cst_116 : f32 to vector<1x256xf32>
    %190 = arith.mulf %186, %189 : vector<1x256xf32>
    %191 = arith.mulf %188, %188 : vector<1x256xf32>
    %192 = arith.subf %190, %191 : vector<1x256xf32>
    %cst_117 = arith.constant 0.000000e+00 : f32
    %193 = vector.broadcast %cst_117 : f32 to vector<1x256xf32>
    %194 = arith.maximumf %192, %193 : vector<1x256xf32>
    %195 = vector.broadcast %188 : vector<1x256xf32> to vector<16x256xf32>
    %196 = arith.subf %179, %195 : vector<16x256xf32>
    %cst_118 = arith.constant 9.99999974E-6 : f32
    %197 = vector.broadcast %cst_118 : f32 to vector<1x256xf32>
    %198 = arith.addf %194, %197 : vector<1x256xf32>
    %199 = math.rsqrt %198 : vector<1x256xf32>
    %200 = vector.broadcast %199 : vector<1x256xf32> to vector<16x256xf32>
    %201 = arith.mulf %196, %200 : vector<16x256xf32>
    %202 = vector.broadcast %180 : vector<1x256xf32> to vector<16x256xf32>
    %203 = arith.mulf %201, %202 : vector<16x256xf32>
    %204 = vector.broadcast %181 : vector<1x256xf32> to vector<16x256xf32>
    %205 = arith.addf %203, %204 : vector<16x256xf32>
    %cst_119 = arith.constant 0.000000e+00 : f32
    %206 = vector.broadcast %cst_119 : f32 to vector<16x256xf32>
    %207 = arith.cmpf ogt, %205, %206 : vector<16x256xf32>
    %cst_120 = arith.constant 0.00999999977 : f32
    %208 = vector.broadcast %cst_120 : f32 to vector<16x256xf32>
    %209 = arith.mulf %208, %205 : vector<16x256xf32>
    %210 = arith.select %207, %205, %209 : vector<16x256xi1>, vector<16x256xf32>
    %c0_121 = arith.constant 0 : index
    %c0_122 = arith.constant 0 : index
    %211 = vector.load %arg33[%c0_121, %c0_122] : memref<256x64xbf16, #tpu.memory_space<vmem>>, vector<256x64xbf16>
    %212 = arith.truncf %210 : vector<16x256xf32> to vector<16x256xbf16>
    %cst_123 = arith.constant dense<0.000000e+00> : vector<16x64xf32>
    %213 = tpu.matmul %212, %211, %cst_123 {dimension_numbers = #tpu.dot_dimension_numbers<[1], [0], [0], [1], [0, 0, 1, 1], [], []>} : vector<16x256xbf16>, vector<256x64xbf16>, vector<16x64xf32> -> vector<16x64xf32>
    %c0_124 = arith.constant 0 : index
    %c0_125 = arith.constant 0 : index
    %214 = vector.load %arg34[%c0_124, %c0_125] : memref<1x64xf32, #tpu.memory_space<vmem>>, vector<1x64xf32>
    %215 = vector.broadcast %214 : vector<1x64xf32> to vector<16x64xf32>
    %216 = arith.addf %213, %215 : vector<16x64xf32>
    %217 = arith.addf %216, %124 : vector<16x64xf32>
    %c0_126 = arith.constant 0 : index
    %c0_127 = arith.constant 0 : index
    %218 = vector.load %arg35[%c0_126, %c0_127] : memref<64x4xbf16, #tpu.memory_space<vmem>>, vector<64x4xbf16>
    %219 = arith.truncf %217 : vector<16x64xf32> to vector<16x64xbf16>
    %cst_128 = arith.constant dense<0.000000e+00> : vector<16x4xf32>
    %220 = tpu.matmul %219, %218, %cst_128 {dimension_numbers = #tpu.dot_dimension_numbers<[1], [0], [0], [1], [0, 0, 1, 1], [], []>} : vector<16x64xbf16>, vector<64x4xbf16>, vector<16x4xf32> -> vector<16x4xf32>
    %c0_129 = arith.constant 0 : index
    %c0_130 = arith.constant 0 : index
    %221 = vector.load %arg36[%c0_129, %c0_130] : memref<1x4xf32, #tpu.memory_space<vmem>>, vector<1x4xf32>
    %222 = vector.broadcast %221 : vector<1x4xf32> to vector<16x4xf32>
    %223 = arith.addf %220, %222 : vector<16x4xf32>
    %c0_131 = arith.constant 0 : index
    %c0_132 = arith.constant 0 : index
    %224 = vector.load %arg37[%c0_131, %c0_132] : memref<16x4xf32, #tpu.memory_space<vmem>>, vector<16x4xf32>
    tpu.vector_store %arg37[%c0_131, %c0_132], %223 {strides = array<i32>} : memref<16x4xf32, #tpu.memory_space<vmem>>, vector<16x4xf32>,
    return
  }
}

</mosaic_0001>

<bundles_post_ra>
// kernel: residual_gnn_forward.1
= control target key start
LH: loop header
LB: loop body
LE: loop exit
PB: predicated region body
PF: predicated region fallthrough
CT: control target
= control target key end

     0   :  { %s1947_s3 = smov 5   ;;  %s1948_s7 = smov 1   ;;  %vm167_vm0 = vcmask 1041408   ;;  %vm163_vm1 = vcmask 31744   ;;  %vm232_vm4 = vcmask 130048   ;;  %vm489_vm10 = vcmask 523264   ;;  %s2300_s0 = inlined_call_operand.smem [shape: u32[38], index: -1, kind: input, shape index: {}] }
   0x1   :  { %s1483_s6 = sld [smem:[%s2300_s0 + %s1947_s3]]   ;;  %s1949_s11 = smov 6  }
   0x2   :  { %s1479_s10 = sld [smem:[%s2300_s0 + %s1948_s7]]   ;;  %s1950_s15 = smov 4  }
   0x3   :  { %s1484_s14 = sld [smem:[%s2300_s0 + %s1949_s11]]   ;;  %s1951_s19 = smov 3  }
   0x4   :  { %s2003_s18 = sld [smem:[%s2300_s0 + %s1950_s15]]   ;;  %s1952_s23 = smov 7  }
   0x5   :  { %s1481_s22 = sld [smem:[%s2300_s0 + %s1951_s19]]   ;;  %s1953_s30 = smov 8  }
   0x6   :  { %s1485_s26 = sld [smem:[%s2300_s0 + %s1952_s23]]   ;;  %s1954_s4 = smov 9  }
   0x7   :  { %v187_v0 = vld [vmem:[%s1483_s6] sm:$0x3]  ;;  %s1_s29 = sld [smem:[%s2300_s0]]   ;;  %s1955_s8 = smov 10  }
   0x8   :  { %v197_v1 = vsel %vm167_vm0, %v187_v0, 0  ;;  %v185_v2 = vld [vmem:[%s1479_s10] sm:$0xff]  ;;  %v186_v3 = vld [vmem:[%s1479_s10 + $0x8] sm:$0xff]  ;;  %s1486_s3 = sld [smem:[%s2300_s0 + %s1953_s30]]   ;;  %s1956_s12 = smov 11  }
   0x9   :  { %206 = vmatpush.bf16.msra.mxu1 %v197_v1  ;;  %v188_v4 = vpack.c.bf16 %v186_v3, %v185_v2  ;;  %v1922_v12 = vld [vmem:[%s1484_s14] ss:$0 sm:$0xff]  ;;  %s2023_s7 = sld [smem:[%s2300_s0 + %s1954_s4]]   ;;  %s1957_s16 = smov 2  }
   0xa   :  { %s2028_s11 = sld [smem:[%s2300_s0 + %s1955_s8]]   ;;  %v1923_v23 = vld [vmem:[%s2003_s18] ss:$0 sm:$0xff]  ;;  %s1958_s20 = smov 12  }
   0xb   :  { %v157_v5 = vld [vmem:[%s1481_s22] sm:$0x3]  ;;  %s1489_s15 = sld [smem:[%s2300_s0 + %s1956_s12]]   ;;  %s1959_s24 = smov 14  }
   0xc   :  { %1517 = vmatmul.msk.bf16.vlgmr.msra.gmra.mxu1 %vm163_vm1, %v188_v4  ;;  %v169_v6 = vsel %vm167_vm0, %v157_v5, 0  ;;  %v1815_v7 = vld [vmem:[%s1485_s26] sm:$0xff]  ;;  %s1480_s19 = sld [smem:[%s2300_s0 + %s1957_s16]]   ;;  %s1960_s28 = smov 13  }
   0xd   :  { %178 = vmatpush.bf16.msra.mxu0 %v169_v6  ;;  %v155_v8 = vld [vmem:[%s1_s29] sm:$0xff]  ;;  %v156_v9 = vld [vmem:[%s1_s29 + $0x8] sm:$0xff]  ;;  %243 = vmatpush.bf16.msra.mxu2 %v1815_v7  ;;  %s1490_s23 = sld [smem:[%s2300_s0 + %s1958_s20]]   ;;  %s1961_s2 = smov 15  }
   0xe   :  { %v158_v10 = vpack.c.bf16 %v156_v9, %v155_v8  ;;  %v1924_v24 = vld [vmem:[%s1486_s3] ss:$0 sm:$0xff]  ;;  %s2071_s27 = sld [smem:[%s2300_s0 + %s1959_s24]]   ;;  %s1962_s6 = smov 21  }
   0xf   :  { %v1925_v5 = vld [vmem:[%s2023_s7] ss:$0 sm:$0xff]  ;;  %s1491_s1 = sld [smem:[%s2300_s0 + %s1960_s28]]   ;;  %s1963_s10 = smov 20  }
  0x10   :  { %1516 = vmatmul.msk.bf16.vlgmr.msra.gmra.mxu0 %vm163_vm1, %v158_v10  ;;  %v1926_v9 = vld [vmem:[%s2028_s11] ss:$0 sm:$0xff]  ;;  %s2080_s5 = sld [smem:[%s2300_s0 + %s1961_s2]]   ;;  %s1964_s14 = smov 16  }
  0x11   :  { %v1817_v22 = vld [vmem:[%s1489_s15] sm:$0xff]  ;;  %s1499_s9 = sld [smem:[%s2300_s0 + %s1962_s6]]   ;;  %s1965_s18 = smov 19  }
  0x12   :  { %393 = vmatpush.bf16.msrb.mxu2 %v1817_v22  ;;  %s2111_s13 = sld [smem:[%s2300_s0 + %s1963_s10]]   ;;  %s1966_s22 = smov 17  }
  0x13   :  { %s1494_s17 = sld [smem:[%s2300_s0 + %s1964_s14]]   ;;  %s1967_s26 = smov 18  }
  0x14   :  { %s2119_s21 = sld [smem:[%s2300_s0 + %s1965_s18]]   ;;  %s1968_s30 = smov 22  }
  0x15   :  { %s1495_s25 = sld [smem:[%s2300_s0 + %s1966_s22]]   ;;  %s1969_s4 = smov 23  }
  0x16   :  { %s1496_s29 = sld [smem:[%s2300_s0 + %s1967_s26]]   ;;  %s1970_s8 = smov 24  }
  0x17   :  { %s1500_s3 = sld [smem:[%s2300_s0 + %s1968_s30]]   ;;  %s1971_s12 = smov 25  }
  0x18   :  { %s2173_s7 = sld [smem:[%s2300_s0 + %s1969_s4]]   ;;  %s1972_s16 = smov 26  }
  0x19   :  { %s2178_s11 = sld [smem:[%s2300_s0 + %s1970_s8]]   ;;  %s1973_s20 = smov 27  }
  0x1a   :  { %s1503_s15 = sld [smem:[%s2300_s0 + %s1971_s12]]   ;;  %s1974_s24 = smov 28  }
  0x1b   :  { %s1975_s28 = smov 29   ;;  %s1976_s2 = smov 34  }
  0x1c   :  { %s1977_s6 = smov 30   ;;  %s1978_s10 = smov 33  }
  0x1d   :  { %s1979_s14 = smov 31   ;;  %s1980_s18 = smov 32  }
  0x1e   :  { %s1981_s22 = smov 36   ;;  %s1982_s26 = smov 35  }
  0x1f   :  { %s1983_s30 = smov 37  }
  0x89   :  { %v208_v11 = vpop.f32.mrf.mxu1 }
  0x8a   :  { %v209_v13 = vadd.f32 %v1922_v12, %v208_v11 }
  0x8c   :  { %v215_v15 = vmul.f32 0.01, %v209_v13  ;;  %vm213_vm2 = vcmp.gt.f32.partialorder %v209_v13, 0.0 }
  0x8d   :  { %v180_v21 = vpop.f32.mrf.mxu0 }
  0x8e   :  { %v217_v18 = vsel %vm213_vm2, %v209_v13, %v215_v15  ;;  %v181_v26 = vadd.f32 %v1923_v23, %v180_v21 }
  0x91   :  { %v210_v14 = vpop.f32.mrf.mxu1 }
  0x92   :  { %v211_v16 = vadd.f32 %v1922_v12, %v210_v14 }
  0x94   :  { %vm214_vm3 = vcmp.gt.f32.partialorder %v211_v16, 0.0  ;;  %v216_v17 = vmul.f32 0.01, %v211_v16 }
  0x95   :  { %v182_v28 = vpop.f32.mrf.mxu0 }
  0x96   :  { %v218_v19 = vsel %vm214_vm3, %v211_v16, %v216_v17  ;;  %v183_v31 = vadd.f32 %v1923_v23, %v182_v28  ;;  %v1570_v28 = vld [vmem:[%s2080_s5 + $0x30] sm:$0xf] }
  0x97   :  { %v221_v20 = vpack.c.bf16 %v218_v19, %v217_v18  ;;  %v2057_v19 = vld [vmem:[%s1480_s19] sm:$0xff]  ;;  %s1504_s19 = sld [smem:[%s2300_s0 + %s1972_s16]]  }
  0x99   :  { %1522 = vmatmul.msk.bf16.vlgmr.msra.gmra.mxu2 %vm232_vm4, %v221_v20  ;;  %v1818_v20 = vld [vmem:[%s1490_s23] sm:$0xff]  ;;  %s1505_s23 = sld [smem:[%s2300_s0 + %s1973_s20]]  }
  0x9a   :  { %370 = vmatpush.bf16.msrb.mxu1 %v1818_v20 }
 0x11c   :  { %v245_v25 = vpop.f32.mrf.mxu2 }
 0x11d   :  { %v246_v27 = vadd.f32 %v1924_v24, %v245_v25 }
 0x11f   :  { %v2034_v29 = vadd.f32 %v246_v27, %v181_v26 }
 0x121   :  { %v263_v33 = vmul.f32 %v2034_v29, %v2034_v29  ;;  %v254_v35 = vsel %vm232_vm4, %v2034_v29, 0.0 }
 0x123   :  { %v265_v40 = vsel %vm232_vm4, %v263_v33, 0.0  ;;  %v1572_v33 = vld [vmem:[%s2080_s5 + $0x38] sm:$0xf0] }
 0x124   :  { %v247_v30 = vpop.f32.mrf.mxu2 }
 0x125   :  { %v248_v32 = vadd.f32 %v1924_v24, %v247_v30  ;;  %v1819_v24 = vld [vmem:[%s1491_s1] sm:$0xff]  ;;  %v1827_v30 = vld [vmem:[%s2080_s5 + $0x34] sm:$0xf0]  ;;  %s1507_s1 = sld [smem:[%s2300_s0 + %s1975_s28]]  }
 0x127   :  { %v2038_v34 = vadd.f32 %v248_v32, %v183_v31  ;;  %v1826_v31 = vld [vmem:[%s2080_s5 + $0x34] sm:$0xf]  ;;  %v1571_v32 = vor.u32 %v1827_v30, %v1570_v28  ;;  %v1840_v28 = vld [vmem:[%s2119_s21 + $0x60] sm:$0xff] }
 0x129   :  { %v255_v36 = vsel %vm232_vm4, %v2038_v34, 0.0  ;;  %v264_v37 = vmul.f32 %v2038_v34, %v2038_v34  ;;  %v789_v38 = vpack.c.bf16 %v2038_v34, %v2034_v29 }
 0x12a   :  { %v256_v39 = vadd.f32 %v255_v36, %v254_v35  ;;  %v1575_v35 = vor.u32 %v1826_v31, %v1572_v33  ;;  %v1562_v36 = vld [vmem:[%s2080_s5 + $0x20] sm:$0xf] }
 0x12b   :  { %v266_v41 = vsel %vm232_vm4, %v264_v37, 0.0  ;;  %v1825_v37 = vld [vmem:[%s2080_s5 + $0x24] sm:$0xf0] }
 0x12c   :  { %v257_v42 = vrot.slane %v256_v39, 4  ;;  %v267_v43 = vadd.f32 %v266_v41, %v265_v40  ;;  %511 = vmatpush.bf16.msra.mxu1 %v1575_v35  ;;  %v1824_v40 = vld [vmem:[%s2080_s5 + $0x24] sm:$0xf]  ;;  %v1564_v41 = vld [vmem:[%s2080_s5 + $0x28] sm:$0xf0] }
 0x12e   :  { %v258_v44 = vadd.f32 %v257_v42, %v256_v39  ;;  %v268_v45 = vrot.slane %v267_v43, 4  ;;  %v1563_v39 = vor.u32 %v1825_v37, %v1562_v36  ;;  %v1567_v42 = vor.u32 %v1824_v40, %v1564_v41  ;;  %v1831_v40 = vld [vmem:[%s2119_s21 + $0x18] sm:$0xff] }
 0x12f   :  { %v1839_v41 = vld [vmem:[%s2119_s21 + $0x58] sm:$0xff] }
 0x130   :  { %v259_v46 = vrot.slane %v258_v44, 2  ;;  %v269_v47 = vadd.f32 %v268_v45, %v267_v43  ;;  %512 = vmatpush.bf16.msra.mxu1 %v1567_v42  ;;  %v1554_v43 = vld [vmem:[%s2080_s5 + $0x10] sm:$0xf]  ;;  %v1822_v45 = vld [vmem:[%s2080_s5 + $0x14] sm:$0xf] }
 0x132   :  { %v260_v48 = vadd.f32 %v259_v46, %v258_v44  ;;  %v270_v49 = vrot.slane %v269_v47, 2  ;;  %v1823_v44 = vld [vmem:[%s2080_s5 + $0x14] sm:$0xf0] }
 0x133   :  { %v1555_v46 = vor.u32 %v1823_v44, %v1554_v43 }
 0x134   :  { %v261_v50 = vrot.slane %v260_v48, 1  ;;  %v271_v51 = vadd.f32 %v270_v49, %v269_v47  ;;  %v1556_v47 = vld [vmem:[%s2080_s5 + $0x18] sm:$0xf0]  ;;  %v1546_v49 = vld [vmem:[%s2080_s5] sm:$0xf] }
 0x136   :  { %v262_v52 = vadd.f32 %v261_v50, %v260_v48  ;;  %v272_v53 = vrot.slane %v271_v51, 1  ;;  %v1559_v48 = vor.u32 %v1822_v45, %v1556_v47  ;;  %v1821_v50 = vld [vmem:[%s2080_s5 + $0x4] sm:$0xf0] }
 0x138   :  { %v273_v54 = vadd.f32 %v272_v53, %v271_v51  ;;  %v274_v55 = vmul.f32 0.0625, %v262_v52  ;;  %513 = vmatpush.bf16.msra.mxu1 %v1559_v48  ;;  %v1820_v51 = vld [vmem:[%s2080_s5 + $0x4] sm:$0xf]  ;;  %v1547_v52 = vor.u32 %v1821_v50, %v1546_v49  ;;  %v1548_v53 = vld [vmem:[%s2080_s5 + $0x8] sm:$0xf0]  ;;  %v1830_v50 = vld [vmem:[%s2119_s21 + $0x10] sm:$0xff]  ;;  %s2229_s5 = sld [smem:[%s2300_s0 + %s1976_s2]]  }
 0x13a   :  { %v275_v56 = vmul.f32 0.0625, %v273_v54  ;;  %v276_v57 = vmul.f32 %v274_v55, %v274_v55  ;;  %v280_v3 = vsub.f32 %v2038_v34, %v274_v55  ;;  %v279_v4 = vsub.f32 %v2034_v29, %v274_v55  ;;  %v1844_v55 = vld [vmem:[%s1499_s9] sm:$0xff]  ;;  %s1508_s9 = sld [smem:[%s2300_s0 + %s1977_s6]]  }
 0x13b   :  { %v1551_v54 = vor.u32 %v1820_v51, %v1548_v53  ;;  %v443_v29 = vld [vmem:[%s1494_s17] sm:$0x3]  ;;  %v1838_v51 = vld [vmem:[%s2119_s21 + $0x50] sm:$0xff]  ;;  %s1509_s17 = sld [smem:[%s2300_s0 + %s1979_s14]]  }
 0x13c   :  { %v277_v58 = vsub.f32 %v275_v56, %v276_v57 }
 0x13d   :  { %514 = vmatpush.bf16.msra.mxu1 %v1551_v54 }
 0x13e   :  { %v278_v59 = vmax.f32 %v277_v58, 0.0 }
 0x140   :  { %v281_v60 = vadd.f32 1e-05, %v278_v59 }
 0x142   :  { %1935 = vrsqrt.f32 %v281_v60  ;;  %vm288_vm6 = vweird.f32 %v281_v60 }
 0x148   :  { %v1936_v61 = vpop.eup %1935 }
 0x149   :  { %v283_v62 = vmul.f32 %v1936_v61, %v281_v60  ;;  %vm289_vm5 = vweird.f32 %v1936_v61 }
 0x14a   :  { %vm290_vm7 = vmor %vm288_vm6, %vm289_vm5 }
 0x14b   :  { %v284_v63 = vmul.f32 %v1936_v61, %v283_v62 }
 0x14d   :  { %v285_v0 = vmul.f32 0.5, %v284_v63 }
 0x14f   :  { %v286_v1 = vsub.f32 1.5, %v285_v0  ;;  %v1927_v0 = vld [vmem:[%s2071_s27] ss:$0 sm:$0xff]  ;;  %s2217_s27 = sld [smem:[%s2300_s0 + %s1974_s24]]  }
 0x151   :  { %v287_v2 = vmul.f32 %v1936_v61, %v286_v1 }
 0x153   :  { %v291_v6 = vsel %vm290_vm7, %v1936_v61, %v287_v2 }
 0x154   :  { %v292_v7 = vmul.f32 %v291_v6, %v279_v4  ;;  %v293_v8 = vmul.f32 %v291_v6, %v280_v3  ;;  %v1835_v6 = vld [vmem:[%s2119_s21 + $0x38] sm:$0xff] }
 0x155   :  { %759 = vmatpush.bf16.msra.mxu2 %v1835_v6 }
 0x156   :  { %v297_v10 = vmul.f32 %v1925_v5, %v292_v7  ;;  %v298_v11 = vmul.f32 %v1925_v5, %v293_v8  ;;  %v1843_v7 = vld [vmem:[%s2119_s21 + $0x78] sm:$0xff]  ;;  %v445_v8 = vperm.slane %v443_v29, 0 }
 0x158   :  { %v302_v12 = vadd.f32 %v1926_v9, %v297_v10  ;;  %v303_v13 = vadd.f32 %v1926_v9, %v298_v11  ;;  %v446_v9 = vperm.slane %v443_v29, 1  ;;  %v1834_v10 = vld [vmem:[%s2119_s21 + $0x30] sm:$0xff] }
 0x159   :  { %v1842_v11 = vld [vmem:[%s2119_s21 + $0x70] sm:$0xff]  ;;  %760 = vmatpush.bf16.msra.mxu2 %v1834_v10 }
 0x15a   :  { %vm304_vm8 = vcmp.gt.f32.partialorder %v302_v12, 0.0  ;;  %vm305_vm9 = vcmp.gt.f32.partialorder %v303_v13, 0.0  ;;  %v306_v14 = vmul.f32 0.01, %v302_v12  ;;  %v307_v15 = vmul.f32 0.01, %v303_v13 }
 0x15c   :  { %v308_v16 = vsel %vm304_vm8, %v302_v12, %v306_v14  ;;  %v309_v17 = vsel %vm305_vm9, %v303_v13, %v307_v15 }
 0x15d   :  { %v310_v18 = vpack.c.bf16 %v309_v17, %v308_v16  ;;  %v1833_v16 = vld [vmem:[%s2119_s21 + $0x28] sm:$0xff] }
 0x15e   :  { %v1841_v17 = vld [vmem:[%s2119_s21 + $0x68] sm:$0xff]  ;;  %761 = vmatpush.bf16.msra.mxu2 %v1833_v16 }
 0x15f   :  { %328 = vmatpush.bf16.msra.mxu3 %v310_v18  ;;  %1538 = vmatmul.msk.bf16.vlgmr.msrb.gmra.mxu2 %vm232_vm4, %v310_v18 }
 0x162   :  { %1527 = vmatmul.msk.bf16.vlgmr.msra.gmra.mxu3 %vm232_vm4, %v2057_v19 }
 0x163   :  { %419 = vmatpush.bf16.msrb.mxu3 %v1819_v24 }
 0x167   :  { %773 = vmatpush.bf16.msra.mxu3 %v1843_v7 }
 0x16b   :  { %774 = vmatpush.bf16.msra.mxu3 %v1842_v11 }
 0x16f   :  { %775 = vmatpush.bf16.msra.mxu3 %v1841_v17 }
 0x173   :  { %776 = vmatpush.bf16.msra.mxu3 %v1840_v28 }
 0x177   :  { %777 = vmatpush.bf16.msra.mxu3 %v1839_v41 }
 0x17b   :  { %778 = vmatpush.bf16.msra.mxu3 %v1838_v51 }
 0x1e2   :  { %v395_v57 = vpop.f32.mrf.mxu2 }
 0x1e5   :  { %v330_v21 = vpop.f32.mrf.mxu3 }
 0x1ea   :  { %v397_v61 = vpop.f32.mrf.mxu2 }
 0x1ed   :  { %v332_v22 = vpop.f32.mrf.mxu3 }
 0x1ee   :  { %v335_v23 = vpack.c.bf16 %v332_v22, %v330_v21 }
 0x1f0   :  { %343 = vmatpush.bf16.msrb.mxu0 %v335_v23  ;;  %1533 = vmatmul.msk.bf16.vlgmr.msrb.gmra.mxu1 %vm232_vm4, %v335_v23 }
 0x1f3   :  { %1528 = vmatmul.msk.bf16.vlgmr.msrb.gmra.mxu0 %vm232_vm4, %v2057_v19 }
 0x1f4   :  { %497 = vmatpush.bf16.msra.mxu0 %v1571_v32 }
 0x1f8   :  { %498 = vmatpush.bf16.msra.mxu0 %v1563_v39 }
 0x1fc   :  { %499 = vmatpush.bf16.msra.mxu0 %v1555_v46 }
 0x200   :  { %500 = vmatpush.bf16.msra.mxu0 %v1547_v52 }
 0x204   :  { %806 = vmatpush.bf16.msrb.mxu0 %v1844_v55 }
 0x26d   :  { %v372_v56 = vpop.f32.mrf.mxu1 }
 0x26e   :  { %v396_v60 = vadd.f32 %v395_v57, %v372_v56 }
 0x270   :  { %v345_v25 = vpop.f32.mrf.mxu0 }
 0x275   :  { %v374_v59 = vpop.f32.mrf.mxu1 }
 0x276   :  { %v398_v62 = vadd.f32 %v397_v61, %v374_v59  ;;  %v1837_v61 = vld [vmem:[%s2119_s21 + $0x48] sm:$0xff] }
 0x277   :  { %779 = vmatpush.bf16.msra.mxu3 %v1837_v61  ;;  %v1928_v61 = vld [vmem:[%s2111_s13] ss:$0 sm:$0xff]  ;;  %s2237_s13 = sld [smem:[%s2300_s0 + %s1978_s10]]  }
 0x278   :  { %v347_v26 = vpop.f32.mrf.mxu0 }
 0x279   :  { %v400_v27 = vpack.c.bf16 %v347_v26, %v345_v25 }
 0x27b   :  { %1543 = vmatmul.msk.bf16.vlgmr.msrb.gmra.mxu3 %vm232_vm4, %v400_v27  ;;  %v1832_v27 = vld [vmem:[%s2119_s21 + $0x20] sm:$0xff] }
 0x27c   :  { %762 = vmatpush.bf16.msra.mxu2 %v1832_v27  ;;  %v522_v27 = vld [vmem:[%s1496_s29] sm:$0x3]  ;;  %s1513_s29 = sld [smem:[%s2300_s0 + %s1982_s26]]  }
 0x280   :  { %763 = vmatpush.bf16.msra.mxu2 %v1831_v40 }
 0x284   :  { %764 = vmatpush.bf16.msra.mxu2 %v1830_v50 }
 0x2fe   :  { %v421_v58 = vpop.f32.mrf.mxu3 }
 0x2ff   :  { %v426_v63 = vadd.f32 %v421_v58, %v396_v60  ;;  %v1829_v60 = vld [vmem:[%s2119_s21 + $0x8] sm:$0xff] }
 0x300   :  { %765 = vmatpush.bf16.msra.mxu2 %v1829_v60 }
 0x301   :  { %v432_v3 = vadd.f32 %v1927_v0, %v426_v63 }
 0x306   :  { %v423_v1 = vpop.f32.mrf.mxu3 }
 0x307   :  { %v427_v2 = vadd.f32 %v423_v1, %v398_v62 }
 0x309   :  { %v433_v4 = vadd.f32 %v1927_v0, %v427_v2  ;;  %v1828_v2 = vld [vmem:[%s2119_s21] sm:$0xff] }
 0x30a   :  { %766 = vmatpush.bf16.msra.mxu2 %v1828_v2 }
 0x30b   :  { %v442_v5 = vpack.c.bf16 %v433_v4, %v432_v3  ;;  %v1836_v3 = vld [vmem:[%s2119_s21 + $0x40] sm:$0xff]  ;;  %s1510_s21 = sld [smem:[%s2300_s0 + %s1980_s18]]  }
 0x30c   :  { %780 = vmatpush.bf16.msra.mxu3 %v1836_v3 }
 0x30d   :  { %1576 = vmatmul.msk.bf16.vlgmr.msra.gmra.mxu0 %vm489_vm10, %v442_v5  ;;  %1577 = vmatmul.msk.bf16.vlgmr.msra.gmra.mxu1 %vm489_vm10, %v442_v5 }
 0x31d   :  { %1646 = vmatmul.msk.bf16.vlgmr.msrb.gmra.mxu0 %vm232_vm4, %v789_v38 }
 0x38a   :  { %v502_v34 = vpop.f32.mrf.mxu0  ;;  %v516_v38 = vpop.f32.mrf.mxu1 }
 0x38b   :  { %v2125_v12 = vadd.f32 %v502_v34, %v445_v8  ;;  %v2127_v13 = vadd.f32 %v516_v38, %v446_v9 }
 0x38d   :  { %v537_v21 = vmul.f32 %v2125_v12, %v2125_v12  ;;  %v538_v22 = vmul.f32 %v2127_v13, %v2127_v13 }
 0x392   :  { %v504_v14 = vpop.f32.mrf.mxu0  ;;  %v518_v15 = vpop.f32.mrf.mxu1 }
 0x393   :  { %v2131_v18 = vadd.f32 %v504_v14, %v445_v8  ;;  %v2133_v20 = vadd.f32 %v518_v15, %v446_v9 }
 0x395   :  { %v523_v23 = vadd.f32 %v2131_v18, %v2125_v12  ;;  %v539_v24 = vmul.f32 %v2131_v18, %v2131_v18  ;;  %v530_v25 = vadd.f32 %v2133_v20, %v2127_v13  ;;  %v540_v26 = vmul.f32 %v2133_v20, %v2133_v20 }
 0x397   :  { %v524_v30 = vrot.slane %v523_v23, 4  ;;  %v541_v31 = vadd.f32 %v539_v24, %v537_v21  ;;  %v531_v32 = vrot.slane %v530_v25, 4  ;;  %v548_v33 = vadd.f32 %v540_v26, %v538_v22 }
 0x399   :  { %v525_v35 = vadd.f32 %v524_v30, %v523_v23  ;;  %v542_v36 = vrot.slane %v541_v31, 4  ;;  %v532_v37 = vadd.f32 %v531_v32, %v530_v25  ;;  %v549_v39 = vrot.slane %v548_v33, 4  ;;  %v521_v23 = vld [vmem:[%s1495_s25] sm:$0x3]  ;;  %s1514_s25 = sld [smem:[%s2300_s0 + %s1981_s22]]  }
 0x39a   :  { %v596_v30 = vperm.slane %v521_v23, 0 }
 0x39b   :  { %v526_v42 = vrot.slane %v525_v35, 2  ;;  %v543_v43 = vadd.f32 %v542_v36, %v541_v31  ;;  %v533_v44 = vrot.slane %v532_v37, 2  ;;  %v550_v45 = vadd.f32 %v549_v39, %v548_v33 }
 0x39c   :  { %v597_v39 = vperm.slane %v521_v23, 1 }
 0x39d   :  { %v527_v46 = vadd.f32 %v526_v42, %v525_v35  ;;  %v544_v47 = vrot.slane %v543_v43, 2  ;;  %v534_v48 = vadd.f32 %v533_v44, %v532_v37  ;;  %v551_v49 = vrot.slane %v550_v45, 2 }
 0x39e   :  { %v605_v42 = vperm.slane %v522_v27, 0 }
 0x39f   :  { %v528_v52 = vrot.slane %v527_v46, 1  ;;  %v545_v53 = vadd.f32 %v544_v47, %v543_v43  ;;  %v535_v54 = vrot.slane %v534_v48, 1  ;;  %v552_v55 = vadd.f32 %v551_v49, %v550_v45 }
 0x3a1   :  { %v529_v56 = vadd.f32 %v528_v52, %v527_v46  ;;  %v546_v57 = vrot.slane %v545_v53, 1  ;;  %v536_v58 = vadd.f32 %v535_v54, %v534_v48  ;;  %v553_v59 = vrot.slane %v552_v55, 1 }
 0x3a2   :  { %v606_v46 = vperm.slane %v522_v27, 1 }
 0x3a3   :  { %v547_v62 = vadd.f32 %v546_v57, %v545_v53  ;;  %v555_v63 = vmul.f32 0.0625, %v529_v56  ;;  %v556_v0 = vmul.f32 0.0625, %v536_v58  ;;  %v554_v1 = vadd.f32 %v553_v59, %v552_v55 }
 0x3a5   :  { %v557_v4 = vmul.f32 0.0625, %v547_v62  ;;  %v559_v5 = vmul.f32 %v555_v63, %v555_v63  ;;  %v558_v29 = vmul.f32 0.0625, %v554_v1  ;;  %v560_v34 = vmul.f32 %v556_v0, %v556_v0  ;;  %v808_v1 = vpop.f32.mrf.mxu0 }
 0x3a6   :  { %v565_v31 = vsub.f32 %v2125_v12, %v555_v63  ;;  %v567_v32 = vsub.f32 %v2131_v18, %v555_v63  ;;  %v566_v36 = vsub.f32 %v2127_v13, %v556_v0  ;;  %v568_v37 = vsub.f32 %v2133_v20, %v556_v0 }
 0x3a7   :  { %v561_v38 = vsub.f32 %v557_v4, %v559_v5  ;;  %v562_v6 = vsub.f32 %v558_v29, %v560_v34  ;;  %v1929_v4 = vld [vmem:[%s1500_s3] ss:$0 sm:$0xff]  ;;  %s1515_s3 = sld [smem:[%s2300_s0 + %s1983_s30]]  }
 0x3a9   :  { %v563_v7 = vmax.f32 %v561_v38, 0.0  ;;  %v564_v8 = vmax.f32 %v562_v6, 0.0 }
 0x3ab   :  { %v569_v9 = vadd.f32 1e-05, %v563_v7  ;;  %v570_v10 = vadd.f32 1e-05, %v564_v8 }
 0x3ad   :  { %1937 = vrsqrt.f32 %v569_v9  ;;  %vm577_vm13 = vweird.f32 %v569_v9  ;;  %vm587_vm15 = vweird.f32 %v570_v10  ;;  %v810_v7 = vpop.f32.mrf.mxu0 }
 0x3ae   :  { %1939 = vrsqrt.f32 %v570_v10 }
 0x3b3   :  { %v1938_v11 = vpop.eup %1937 }
 0x3b4   :  { %v1940_v14 = vpop.eup %1939  ;;  %v572_v15 = vmul.f32 %v1938_v11, %v569_v9  ;;  %vm578_vm11 = vweird.f32 %v1938_v11 }
 0x3b5   :  { %v582_v16 = vmul.f32 %v1940_v14, %v570_v10  ;;  %vm588_vm12 = vweird.f32 %v1940_v14  ;;  %vm579_vm14 = vmor %vm577_vm13, %vm578_vm11 }
 0x3b6   :  { %v573_v17 = vmul.f32 %v1938_v11, %v572_v15  ;;  %vm589_vm0 = vmor %vm587_vm15, %vm588_vm12 }
 0x3b7   :  { %v583_v21 = vmul.f32 %v1940_v14, %v582_v16 }
 0x3b8   :  { %v574_v22 = vmul.f32 0.5, %v573_v17 }
 0x3b9   :  { %v584_v24 = vmul.f32 0.5, %v583_v21 }
 0x3ba   :  { %v575_v25 = vsub.f32 1.5, %v574_v22 }
 0x3bb   :  { %v585_v26 = vsub.f32 1.5, %v584_v24 }
 0x3bc   :  { %v576_v28 = vmul.f32 %v1938_v11, %v575_v25 }
 0x3bd   :  { %v586_v33 = vmul.f32 %v1940_v14, %v585_v26  ;;  %v1848_v26 = vld [vmem:[%s1503_s15 + $0x18] sm:$0xff] }
 0x3be   :  { %v580_v35 = vsel %vm579_vm14, %v1938_v11, %v576_v28  ;;  %997 = vmatpush.bf16.msrb.mxu2 %v1848_v26  ;;  %v1862_v26 = vld [vmem:[%s1507_s1 + $0x24] sm:$0xf0] }
 0x3bf   :  { %v591_v40 = vmul.f32 %v580_v35, %v565_v31  ;;  %v593_v41 = vmul.f32 %v580_v35, %v567_v32  ;;  %v590_v43 = vsel %vm589_vm0, %v1940_v14, %v586_v33  ;;  %v1847_v32 = vld [vmem:[%s1503_s15 + $0x10] sm:$0xff] }
 0x3c0   :  { %v592_v44 = vmul.f32 %v590_v43, %v566_v36  ;;  %v594_v45 = vmul.f32 %v590_v43, %v568_v37  ;;  %v1846_v36 = vld [vmem:[%s1503_s15 + $0x8] sm:$0xff] }
 0x3c1   :  { %v600_v12 = vmul.f32 %v596_v30, %v591_v40  ;;  %v602_v47 = vmul.f32 %v596_v30, %v593_v41 }
 0x3c2   :  { %v601_v18 = vmul.f32 %v597_v39, %v592_v44  ;;  %v603_v48 = vmul.f32 %v597_v39, %v594_v45  ;;  %998 = vmatpush.bf16.msrb.mxu2 %v1847_v32  ;;  %v1710_v32 = vld [vmem:[%s1507_s1 + $0x10] sm:$0xf] }
 0x3c3   :  { %v611_v49 = vadd.f32 %v605_v42, %v602_v47  ;;  %v609_v50 = vadd.f32 %v605_v42, %v600_v12  ;;  %v1845_v42 = vld [vmem:[%s1503_s15] sm:$0xff] }
 0x3c4   :  { %v612_v51 = vadd.f32 %v606_v46, %v603_v48  ;;  %v610_v52 = vadd.f32 %v606_v46, %v601_v18 }
 0x3c5   :  { %vm613_vm2 = vcmp.gt.f32.partialorder %v609_v50, 0.0  ;;  %vm615_vm3 = vcmp.gt.f32.partialorder %v611_v49, 0.0  ;;  %v617_v13 = vmul.f32 0.01, %v609_v50  ;;  %v619_v20 = vmul.f32 0.01, %v611_v49 }
 0x3c6   :  { %vm614_vm5 = vcmp.gt.f32.partialorder %v610_v52, 0.0  ;;  %vm616_vm6 = vcmp.gt.f32.partialorder %v612_v51, 0.0  ;;  %v618_v53 = vmul.f32 0.01, %v610_v52  ;;  %v620_v54 = vmul.f32 0.01, %v612_v51  ;;  %999 = vmatpush.bf16.msrb.mxu2 %v1846_v36 }
 0x3c7   :  { %v621_v55 = vsel %vm613_vm2, %v609_v50, %v617_v13  ;;  %v623_v56 = vsel %vm615_vm3, %v611_v49, %v619_v20  ;;  %v1930_v20 = vld [vmem:[%s2173_s7] ss:$0 sm:$0xff] }
 0x3c8   :  { %v657_v57 = vpack.c.bf16 %v623_v56, %v621_v55  ;;  %v622_v58 = vsel %vm614_vm5, %v610_v52, %v618_v53  ;;  %v624_v59 = vsel %vm616_vm6, %v612_v51, %v620_v54  ;;  %v1931_v56 = vld [vmem:[%s2178_s11] ss:$0 sm:$0xff] }
 0x3c9   :  { %v658_v60 = vpack.c.bf16 %v624_v59, %v622_v58 }
 0x3ca   :  { %767 = vmatmul.bf16.vlgmr.msra.gmra.mxu2 %v657_v57 }
 0x3cb   :  { %781 = vmatmul.bf16.vlgmr.msra.gmra.mxu3 %v658_v60  ;;  %1000 = vmatpush.bf16.msrb.mxu2 %v1845_v42  ;;  %v1857_v42 = vld [vmem:[%s1507_s1 + $0x4] sm:$0xf] }
 0x44d   :  { %v768_v62 = vpop.f32.mrf.mxu2 }
 0x44e   :  { %v769_v63 = vadd.f32 %v1928_v61, %v768_v62  ;;  %v782_v0 = vpop.f32.mrf.mxu3 }
 0x450   :  { %v783_v2 = vadd.f32 %v782_v0, %v769_v63 }
 0x452   :  { %v813_v3 = vadd.f32 %v808_v1, %v783_v2  ;;  %v1852_v1 = vld [vmem:[%s1504_s19 + $0x18] sm:$0xff] }
 0x454   :  { %v2181_v38 = vadd.f32 %v1929_v4, %v813_v3  ;;  %v1851_v3 = vld [vmem:[%s1504_s19 + $0x10] sm:$0xff] }
 0x455   :  { %v770_v5 = vpop.f32.mrf.mxu2 }
 0x456   :  { %v771_v29 = vadd.f32 %v1928_v61, %v770_v5  ;;  %v784_v34 = vpop.f32.mrf.mxu3  ;;  %v832_v9 = vmul.f32 %v2181_v38, %v2181_v38  ;;  %v823_v11 = vsel %vm489_vm10, %v2181_v38, 0.0  ;;  %v1849_v5 = vld [vmem:[%s1504_s19] sm:$0xff] }
 0x458   :  { %v785_v6 = vadd.f32 %v784_v34, %v771_v29  ;;  %v834_v17 = vsel %vm489_vm10, %v832_v9, 0.0  ;;  %v1856_v29 = vld [vmem:[%s1505_s23 + $0x18] sm:$0xff]  ;;  %v1854_v9 = vld [vmem:[%s1505_s23 + $0x8] sm:$0xff] }
 0x459   :  { %1047 = vmatpush.bf16.msrb.mxu3 %v1856_v29  ;;  %v1878_v29 = vld [vmem:[%s2237_s13 + $0x68] sm:$0xff] }
 0x45a   :  { %v814_v8 = vadd.f32 %v810_v7, %v785_v6 }
 0x45c   :  { %v2185_v10 = vadd.f32 %v1929_v4, %v814_v8  ;;  %v1850_v4 = vld [vmem:[%s1504_s19 + $0x8] sm:$0xff]  ;;  %v1855_v8 = vld [vmem:[%s1505_s23 + $0x10] sm:$0xff] }
 0x45d   :  { %1048 = vmatpush.bf16.msrb.mxu3 %v1855_v8 }
 0x45e   :  { %v824_v14 = vsel %vm489_vm10, %v2185_v10, 0.0  ;;  %v833_v15 = vmul.f32 %v2185_v10, %v2185_v10 }
 0x45f   :  { %v825_v16 = vadd.f32 %v824_v14, %v823_v11  ;;  %v1853_v11 = vld [vmem:[%s1505_s23] sm:$0xff] }
 0x460   :  { %v835_v21 = vsel %vm489_vm10, %v833_v15, 0.0 }
 0x461   :  { %v826_v22 = vrot.slane %v825_v16, 4  ;;  %v836_v23 = vadd.f32 %v835_v21, %v834_v17  ;;  %1049 = vmatpush.bf16.msrb.mxu3 %v1854_v9  ;;  %v1864_v17 = vld [vmem:[%s1507_s1 + $0x34] sm:$0xf0]  ;;  %v1863_v21 = vld [vmem:[%s1507_s1 + $0x34] sm:$0xf] }
 0x463   :  { %v827_v24 = vadd.f32 %v826_v22, %v825_v16  ;;  %v837_v25 = vrot.slane %v836_v23, 4 }
 0x465   :  { %v828_v27 = vrot.slane %v827_v24, 2  ;;  %v838_v28 = vadd.f32 %v837_v25, %v836_v23  ;;  %1050 = vmatpush.bf16.msrb.mxu3 %v1853_v11  ;;  %v1728_v23 = vld [vmem:[%s1507_s1 + $0x38] sm:$0xf0]  ;;  %v1718_v25 = vld [vmem:[%s1507_s1 + $0x20] sm:$0xf] }
 0x467   :  { %v829_v30 = vadd.f32 %v828_v27, %v827_v24  ;;  %v839_v31 = vrot.slane %v838_v28, 2  ;;  %v1731_v24 = vor.u32 %v1863_v21, %v1728_v23  ;;  %v1861_v27 = vld [vmem:[%s1507_s1 + $0x24] sm:$0xf] }
 0x469   :  { %v830_v33 = vrot.slane %v829_v30, 1  ;;  %v840_v35 = vadd.f32 %v839_v31, %v838_v28  ;;  %v1719_v28 = vor.u32 %v1862_v26, %v1718_v25 }
 0x46b   :  { %v831_v37 = vadd.f32 %v830_v33, %v829_v30  ;;  %v841_v39 = vrot.slane %v840_v35, 1  ;;  %v1720_v30 = vld [vmem:[%s1507_s1 + $0x28] sm:$0xf0]  ;;  %v1860_v33 = vld [vmem:[%s1507_s1 + $0x14] sm:$0xf0] }
 0x46c   :  { %v1723_v31 = vor.u32 %v1861_v27, %v1720_v30  ;;  %v1711_v36 = vor.u32 %v1860_v33, %v1710_v32  ;;  %v1876_v30 = vld [vmem:[%s2237_s13 + $0x58] sm:$0xff] }
 0x46d   :  { %v842_v40 = vadd.f32 %v841_v39, %v840_v35  ;;  %v843_v41 = vmul.f32 0.0625, %v831_v37  ;;  %v1859_v35 = vld [vmem:[%s1507_s1 + $0x14] sm:$0xf]  ;;  %v1712_v37 = vld [vmem:[%s1507_s1 + $0x18] sm:$0xf0] }
 0x46e   :  { %v1715_v39 = vor.u32 %v1859_v35, %v1712_v37 }
 0x46f   :  { %v844_v43 = vmul.f32 0.0625, %v842_v40  ;;  %v845_v44 = vmul.f32 %v843_v41, %v843_v41  ;;  %v848_v52 = vsub.f32 %v2181_v38, %v843_v41  ;;  %v849_v13 = vsub.f32 %v2185_v10, %v843_v41  ;;  %v1702_v40 = vld [vmem:[%s1507_s1] sm:$0xf]  ;;  %v1858_v41 = vld [vmem:[%s1507_s1 + $0x4] sm:$0xf0] }
 0x471   :  { %v846_v45 = vsub.f32 %v844_v43, %v845_v44  ;;  %v1703_v43 = vor.u32 %v1858_v41, %v1702_v40  ;;  %v1704_v44 = vld [vmem:[%s1507_s1 + $0x8] sm:$0xf0]  ;;  %v1867_v41 = vld [vmem:[%s2237_s13 + $0x10] sm:$0xff] }
 0x473   :  { %v847_v46 = vmax.f32 %v846_v45, 0.0  ;;  %v1707_v45 = vor.u32 %v1857_v42, %v1704_v44  ;;  %v1875_v42 = vld [vmem:[%s2237_s13 + $0x50] sm:$0xff] }
 0x475   :  { %v850_v12 = vadd.f32 1e-05, %v847_v46 }
 0x477   :  { %1941 = vrsqrt.f32 %v850_v12  ;;  %vm857_vm8 = vweird.f32 %v850_v12 }
 0x47d   :  { %v1942_v47 = vpop.eup %1941 }
 0x47e   :  { %v852_v18 = vmul.f32 %v1942_v47, %v850_v12  ;;  %vm858_vm7 = vweird.f32 %v1942_v47 }
 0x47f   :  { %vm859_vm9 = vmor %vm857_vm8, %vm858_vm7 }
 0x480   :  { %v853_v48 = vmul.f32 %v1942_v47, %v852_v18 }
 0x482   :  { %v854_v49 = vmul.f32 0.5, %v853_v48 }
 0x484   :  { %v855_v50 = vsub.f32 1.5, %v854_v49 }
 0x486   :  { %v856_v51 = vmul.f32 %v1942_v47, %v855_v50 }
 0x488   :  { %v860_v53 = vsel %vm859_vm9, %v1942_v47, %v856_v51 }
 0x489   :  { %v861_v54 = vmul.f32 %v860_v53, %v848_v52  ;;  %v862_v55 = vmul.f32 %v860_v53, %v849_v13  ;;  %v1932_v52 = vld [vmem:[%s2217_s27] ss:$0 sm:$0xff] }
 0x48b   :  { %v866_v57 = vmul.f32 %v1930_v20, %v861_v54  ;;  %v867_v58 = vmul.f32 %v1930_v20, %v862_v55 }
 0x48d   :  { %v871_v59 = vadd.f32 %v1931_v56, %v866_v57  ;;  %v872_v60 = vadd.f32 %v1931_v56, %v867_v58  ;;  %v1074_v56 = vld [vmem:[%s1508_s9] sm:$0x3] }
 0x48f   :  { %vm873_vm11 = vcmp.gt.f32.partialorder %v871_v59, 0.0  ;;  %vm874_vm12 = vcmp.gt.f32.partialorder %v872_v60, 0.0  ;;  %v875_v61 = vmul.f32 0.01, %v871_v59  ;;  %v876_v62 = vmul.f32 0.01, %v872_v60 }
 0x491   :  { %v877_v63 = vsel %vm873_vm11, %v871_v59, %v875_v61  ;;  %v878_v0 = vsel %vm874_vm12, %v872_v60, %v876_v62  ;;  %v1872_v59 = vld [vmem:[%s2237_s13 + $0x38] sm:$0xff]  ;;  %v1076_v61 = vperm.slane %v1074_v56, 0  ;;  %v1077_v62 = vperm.slane %v1074_v56, 1 }
 0x492   :  { %v879_v2 = vpack.c.bf16 %v878_v0, %v877_v63  ;;  %v1880_v60 = vld [vmem:[%s2237_s13 + $0x78] sm:$0xff]  ;;  %1389 = vmatpush.bf16.msra.mxu2 %v1872_v59  ;;  %v1871_v63 = vld [vmem:[%s2237_s13 + $0x30] sm:$0xff] }
 0x493   :  { %1403 = vmatpush.bf16.msra.mxu3 %v1880_v60  ;;  %v1879_v0 = vld [vmem:[%s2237_s13 + $0x70] sm:$0xff] }
 0x494   :  { %887 = vmatpush.bf16.msrb.mxu1 %v879_v2  ;;  %1682 = vmatmul.msk.bf16.vlgmr.msrb.gmra.mxu2 %vm489_vm10, %v879_v2 }
 0x496   :  { %1390 = vmatpush.bf16.msra.mxu2 %v1871_v63 }
 0x497   :  { %1647 = vmatmul.msk.bf16.vlgmr.msrb.gmra.mxu1 %vm232_vm4, %v2057_v19  ;;  %1404 = vmatpush.bf16.msra.mxu3 %v1879_v0 }
 0x498   :  { %956 = vmatpush.bf16.msra.mxu1 %v1852_v1 }
 0x49b   :  { %1405 = vmatpush.bf16.msra.mxu3 %v1878_v29 }
 0x49c   :  { %957 = vmatpush.bf16.msra.mxu1 %v1851_v3 }
 0x4a0   :  { %958 = vmatpush.bf16.msra.mxu1 %v1850_v4 }
 0x4a4   :  { %959 = vmatpush.bf16.msra.mxu1 %v1849_v5  ;;  %v1870_v5 = vld [vmem:[%s2237_s13 + $0x28] sm:$0xff] }
 0x4a5   :  { %1391 = vmatpush.bf16.msra.mxu2 %v1870_v5 }
 0x4a8   :  { %1141 = vmatpush.bf16.msrb.mxu1 %v1731_v24 }
 0x4ac   :  { %1142 = vmatpush.bf16.msrb.mxu1 %v1723_v31 }
 0x4b0   :  { %1143 = vmatpush.bf16.msrb.mxu1 %v1715_v39 }
 0x4b4   :  { %1144 = vmatpush.bf16.msrb.mxu1 %v1707_v45 }
 0x514   :  { %v889_v34 = vpop.f32.mrf.mxu1 }
 0x517   :  { %v1002_v12 = vpop.f32.mrf.mxu2 }
 0x51c   :  { %v891_v6 = vpop.f32.mrf.mxu1 }
 0x51d   :  { %v894_v7 = vpack.c.bf16 %v891_v6, %v889_v34 }
 0x51f   :  { %902 = vmatpush.bf16.msra.mxu0 %v894_v7  ;;  %1665 = vmatmul.msk.bf16.vlgmr.msra.gmra.mxu1 %vm489_vm10, %v894_v7  ;;  %v1004_v49 = vpop.f32.mrf.mxu2 }
 0x522   :  { %1648 = vmatmul.msk.bf16.vlgmr.msra.gmra.mxu0 %vm232_vm4, %v2057_v19  ;;  %v1726_v19 = vld [vmem:[%s1507_s1 + $0x30] sm:$0xf] }
 0x523   :  { %v1727_v22 = vor.u32 %v1864_v17, %v1726_v19  ;;  %v1877_v19 = vld [vmem:[%s2237_s13 + $0x60] sm:$0xff] }
 0x524   :  { %1406 = vmatpush.bf16.msra.mxu3 %v1877_v19  ;;  %v1152_v19 = vld [vmem:[%s1510_s21] sm:$0x3] }
 0x525   :  { %1127 = vmatpush.bf16.msrb.mxu0 %v1727_v22 }
 0x528   :  { %1407 = vmatpush.bf16.msra.mxu3 %v1876_v30 }
 0x529   :  { %1128 = vmatpush.bf16.msrb.mxu0 %v1719_v28  ;;  %v1868_v28 = vld [vmem:[%s2237_s13 + $0x18] sm:$0xff] }
 0x52c   :  { %1408 = vmatpush.bf16.msra.mxu3 %v1875_v42 }
 0x52d   :  { %1129 = vmatpush.bf16.msrb.mxu0 %v1711_v36 }
 0x531   :  { %1130 = vmatpush.bf16.msrb.mxu0 %v1703_v43 }
 0x59c   :  { %v961_v46 = vpop.f32.mrf.mxu1 }
 0x59d   :  { %v1003_v48 = vadd.f32 %v1002_v12, %v961_v46 }
 0x59f   :  { %v904_v14 = vpop.f32.mrf.mxu0 }
 0x5a4   :  { %v963_v18 = vpop.f32.mrf.mxu1 }
 0x5a5   :  { %v1005_v50 = vadd.f32 %v1004_v49, %v963_v18  ;;  %v1866_v49 = vld [vmem:[%s2237_s13 + $0x8] sm:$0xff] }
 0x5a7   :  { %v906_v15 = vpop.f32.mrf.mxu0 }
 0x5a8   :  { %v1007_v16 = vpack.c.bf16 %v906_v15, %v904_v14 }
 0x5aa   :  { %1699 = vmatmul.msk.bf16.vlgmr.msrb.gmra.mxu3 %vm489_vm10, %v1007_v16  ;;  %v1869_v16 = vld [vmem:[%s2237_s13 + $0x20] sm:$0xff] }
 0x5ab   :  { %1392 = vmatpush.bf16.msra.mxu2 %v1869_v16 }
 0x5af   :  { %1393 = vmatpush.bf16.msra.mxu2 %v1868_v28 }
 0x5b3   :  { %1394 = vmatpush.bf16.msra.mxu2 %v1867_v41 }
 0x5b7   :  { %1395 = vmatpush.bf16.msra.mxu2 %v1866_v49 }
 0x62d   :  { %v1052_v47 = vpop.f32.mrf.mxu3 }
 0x62e   :  { %v1057_v51 = vadd.f32 %v1052_v47, %v1003_v48 }
 0x630   :  { %v1063_v53 = vadd.f32 %v1932_v52, %v1057_v51 }
 0x635   :  { %v1054_v13 = vpop.f32.mrf.mxu3 }
 0x636   :  { %v1058_v20 = vadd.f32 %v1054_v13, %v1005_v50  ;;  %v1874_v50 = vld [vmem:[%s2237_s13 + $0x48] sm:$0xff] }
 0x637   :  { %1409 = vmatpush.bf16.msra.mxu3 %v1874_v50 }
 0x638   :  { %v1064_v54 = vadd.f32 %v1932_v52, %v1058_v20 }
 0x63a   :  { %v1073_v55 = vpack.c.bf16 %v1064_v54, %v1063_v53  ;;  %v1865_v53 = vld [vmem:[%s2237_s13] sm:$0xff] }
 0x63b   :  { %v1873_v54 = vld [vmem:[%s2237_s13 + $0x40] sm:$0xff]  ;;  %1396 = vmatpush.bf16.msra.mxu2 %v1865_v53 }
 0x63c   :  { %1732 = vmatmul.msk.bf16.vlgmr.msrb.gmra.mxu0 %vm489_vm10, %v1073_v55  ;;  %1733 = vmatmul.msk.bf16.vlgmr.msrb.gmra.mxu1 %vm489_vm10, %v1073_v55 }
 0x63d   :  { %1410 = vmatpush.bf16.msra.mxu3 %v1873_v54  ;;  %v1933_v54 = vld [vmem:[%s2229_s5] ss:$0 sm:$0xff] }
 0x6b9   :  { %v1132_v57 = vpop.f32.mrf.mxu0  ;;  %v1146_v58 = vpop.f32.mrf.mxu1 }
 0x6ba   :  { %v2243_v1 = vadd.f32 %v1132_v57, %v1076_v61  ;;  %v2245_v2 = vadd.f32 %v1146_v58, %v1077_v62 }
 0x6bc   :  { %v1167_v7 = vmul.f32 %v2243_v1, %v2243_v1  ;;  %v1168_v8 = vmul.f32 %v2245_v2, %v2245_v2 }
 0x6c1   :  { %v1134_v3 = vpop.f32.mrf.mxu0  ;;  %v1148_v4 = vpop.f32.mrf.mxu1 }
 0x6c2   :  { %v2249_v34 = vadd.f32 %v1134_v3, %v1076_v61  ;;  %v2251_v6 = vadd.f32 %v1148_v4, %v1077_v62 }
 0x6c4   :  { %v1153_v9 = vadd.f32 %v2249_v34, %v2243_v1  ;;  %v1169_v11 = vmul.f32 %v2249_v34, %v2249_v34  ;;  %v1160_v14 = vadd.f32 %v2251_v6, %v2245_v2  ;;  %v1170_v15 = vmul.f32 %v2251_v6, %v2251_v6 }
 0x6c6   :  { %v1154_v17 = vrot.slane %v1153_v9, 4  ;;  %v1171_v21 = vadd.f32 %v1169_v11, %v1167_v7  ;;  %v1161_v22 = vrot.slane %v1160_v14, 4  ;;  %v1178_v23 = vadd.f32 %v1170_v15, %v1168_v8  ;;  %v1151_v11 = vld [vmem:[%s1509_s17] sm:$0x3] }
 0x6c7   :  { %v1227_v28 = vperm.slane %v1151_v11, 1 }
 0x6c8   :  { %v1155_v24 = vadd.f32 %v1154_v17, %v1153_v9  ;;  %v1172_v25 = vrot.slane %v1171_v21, 4  ;;  %v1162_v26 = vadd.f32 %v1161_v22, %v1160_v14  ;;  %v1179_v27 = vrot.slane %v1178_v23, 4 }
 0x6ca   :  { %v1156_v31 = vrot.slane %v1155_v24, 2  ;;  %v1173_v32 = vadd.f32 %v1172_v25, %v1171_v21  ;;  %v1163_v33 = vrot.slane %v1162_v26, 2  ;;  %v1180_v35 = vadd.f32 %v1179_v27, %v1178_v23 }
 0x6cb   :  { %v1226_v21 = vperm.slane %v1151_v11, 0 }
 0x6cc   :  { %v1157_v36 = vadd.f32 %v1156_v31, %v1155_v24  ;;  %v1174_v37 = vrot.slane %v1173_v32, 2  ;;  %v1164_v39 = vadd.f32 %v1163_v33, %v1162_v26  ;;  %v1181_v40 = vrot.slane %v1180_v35, 2 }
 0x6ce   :  { %v1158_v43 = vrot.slane %v1157_v36, 1  ;;  %v1175_v44 = vadd.f32 %v1174_v37, %v1173_v32  ;;  %v1165_v45 = vrot.slane %v1164_v39, 1  ;;  %v1182_v46 = vadd.f32 %v1181_v40, %v1180_v35 }
 0x6cf   :  { %v1235_v32 = vperm.slane %v1152_v19, 0  ;;  %v1236_v37 = vperm.slane %v1152_v19, 1 }
 0x6d0   :  { %v1159_v12 = vadd.f32 %v1158_v43, %v1157_v36  ;;  %v1176_v47 = vrot.slane %v1175_v44, 1  ;;  %v1166_v18 = vadd.f32 %v1165_v45, %v1164_v39  ;;  %v1183_v48 = vrot.slane %v1182_v46, 1 }
 0x6d2   :  { %v1177_v51 = vadd.f32 %v1176_v47, %v1175_v44  ;;  %v1185_v52 = vmul.f32 0.0625, %v1159_v12  ;;  %v1186_v13 = vmul.f32 0.0625, %v1166_v18  ;;  %v1184_v20 = vadd.f32 %v1183_v48, %v1182_v46 }
 0x6d4   :  { %v1187_v55 = vmul.f32 0.0625, %v1177_v51  ;;  %v1189_v56 = vmul.f32 %v1185_v52, %v1185_v52  ;;  %v1188_v57 = vmul.f32 0.0625, %v1184_v20  ;;  %v1190_v58 = vmul.f32 %v1186_v13, %v1186_v13  ;;  %v1884_v51 = vld [vmem:[%s1513_s29 + $0x18] sm:$0xff]  ;;  %v1881_v20 = vld [vmem:[%s1513_s29] sm:$0xff] }
 0x6d5   :  { %v1195_v22 = vsub.f32 %v2243_v1, %v1185_v52  ;;  %v1197_v23 = vsub.f32 %v2249_v34, %v1185_v52  ;;  %v1196_v26 = vsub.f32 %v2245_v2, %v1186_v13  ;;  %v1198_v27 = vsub.f32 %v2251_v6, %v1186_v13  ;;  %1463 = vmatpush.bf16.msra.mxu0 %v1884_v51  ;;  %v1883_v52 = vld [vmem:[%s1513_s29 + $0x10] sm:$0xff]  ;;  %v1882_v13 = vld [vmem:[%s1513_s29 + $0x8] sm:$0xff] }
 0x6d6   :  { %v1191_v59 = vsub.f32 %v1187_v55, %v1189_v56  ;;  %v1192_v60 = vsub.f32 %v1188_v57, %v1190_v58 }
 0x6d8   :  { %v1193_v61 = vmax.f32 %v1191_v59, 0.0  ;;  %v1194_v62 = vmax.f32 %v1192_v60, 0.0 }
 0x6d9   :  { %1464 = vmatpush.bf16.msra.mxu0 %v1883_v52 }
 0x6da   :  { %v1199_v63 = vadd.f32 1e-05, %v1193_v61  ;;  %v1200_v0 = vadd.f32 1e-05, %v1194_v62 }
 0x6dc   :  { %1943 = vrsqrt.f32 %v1199_v63  ;;  %vm1207_vm14 = vweird.f32 %v1199_v63  ;;  %vm1217_vm0 = vweird.f32 %v1200_v0 }
 0x6dd   :  { %1945 = vrsqrt.f32 %v1200_v0  ;;  %1465 = vmatpush.bf16.msra.mxu0 %v1882_v13 }
 0x6e1   :  { %1466 = vmatpush.bf16.msra.mxu0 %v1881_v20 }
 0x6e2   :  { %v1944_v3 = vpop.eup %1943 }
 0x6e3   :  { %v1946_v4 = vpop.eup %1945  ;;  %v1202_v5 = vmul.f32 %v1944_v3, %v1199_v63  ;;  %vm1208_vm4 = vweird.f32 %v1944_v3 }
 0x6e4   :  { %v1212_v29 = vmul.f32 %v1946_v4, %v1200_v0  ;;  %vm1218_vm13 = vweird.f32 %v1946_v4  ;;  %vm1209_vm15 = vmor %vm1207_vm14, %vm1208_vm4 }
 0x6e5   :  { %v1203_v7 = vmul.f32 %v1944_v3, %v1202_v5  ;;  %vm1219_vm2 = vmor %vm1217_vm0, %vm1218_vm13 }
 0x6e6   :  { %v1213_v8 = vmul.f32 %v1946_v4, %v1212_v29 }
 0x6e7   :  { %v1204_v9 = vmul.f32 0.5, %v1203_v7 }
 0x6e8   :  { %v1214_v14 = vmul.f32 0.5, %v1213_v8 }
 0x6e9   :  { %v1205_v15 = vsub.f32 1.5, %v1204_v9 }
 0x6ea   :  { %v1215_v16 = vsub.f32 1.5, %v1214_v14 }
 0x6eb   :  { %v1206_v17 = vmul.f32 %v1944_v3, %v1205_v15 }
 0x6ec   :  { %v1216_v24 = vmul.f32 %v1946_v4, %v1215_v16 }
 0x6ed   :  { %v1210_v25 = vsel %vm1209_vm15, %v1944_v3, %v1206_v17  ;;  %v1934_v3 = vld [vmem:[%s1514_s25] ss:$0 sm:$0xff] }
 0x6ee   :  { %v1221_v30 = vmul.f32 %v1210_v25, %v1195_v22  ;;  %v1223_v31 = vmul.f32 %v1210_v25, %v1197_v23  ;;  %v1220_v33 = vsel %vm1219_vm2, %v1946_v4, %v1216_v24 }
 0x6ef   :  { %v1222_v35 = vmul.f32 %v1220_v33, %v1196_v26  ;;  %v1224_v36 = vmul.f32 %v1220_v33, %v1198_v27 }
 0x6f0   :  { %v1230_v1 = vmul.f32 %v1226_v21, %v1221_v30  ;;  %v1232_v39 = vmul.f32 %v1226_v21, %v1223_v31 }
 0x6f1   :  { %v1231_v34 = vmul.f32 %v1227_v28, %v1222_v35  ;;  %v1233_v40 = vmul.f32 %v1227_v28, %v1224_v36 }
 0x6f2   :  { %v1241_v41 = vadd.f32 %v1235_v32, %v1232_v39  ;;  %v1239_v42 = vadd.f32 %v1235_v32, %v1230_v1 }
 0x6f3   :  { %v1242_v43 = vadd.f32 %v1236_v37, %v1233_v40  ;;  %v1240_v44 = vadd.f32 %v1236_v37, %v1231_v34 }
 0x6f4   :  { %vm1243_vm3 = vcmp.gt.f32.partialorder %v1239_v42, 0.0  ;;  %vm1245_vm5 = vcmp.gt.f32.partialorder %v1241_v41, 0.0  ;;  %v1247_v2 = vmul.f32 0.01, %v1239_v42  ;;  %v1249_v6 = vmul.f32 0.01, %v1241_v41 }
 0x6f5   :  { %vm1244_vm6 = vcmp.gt.f32.partialorder %v1240_v44, 0.0  ;;  %vm1246_vm7 = vcmp.gt.f32.partialorder %v1242_v43, 0.0  ;;  %v1248_v45 = vmul.f32 0.01, %v1240_v44  ;;  %v1250_v46 = vmul.f32 0.01, %v1242_v43 }
 0x6f6   :  { %v1251_v12 = vsel %vm1243_vm3, %v1239_v42, %v1247_v2  ;;  %v1253_v47 = vsel %vm1245_vm5, %v1241_v41, %v1249_v6 }
 0x6f7   :  { %v1287_v18 = vpack.c.bf16 %v1253_v47, %v1251_v12  ;;  %v1252_v48 = vsel %vm1244_vm6, %v1240_v44, %v1248_v45  ;;  %v1254_v49 = vsel %vm1246_vm7, %v1242_v43, %v1250_v46 }
 0x6f8   :  { %v1288_v50 = vpack.c.bf16 %v1254_v49, %v1252_v48 }
 0x6f9   :  { %1397 = vmatmul.bf16.vlgmr.msra.gmra.mxu2 %v1287_v18 }
 0x6fa   :  { %1411 = vmatmul.bf16.vlgmr.msra.gmra.mxu3 %v1288_v50 }
 0x77c   :  { %v1398_v53 = vpop.f32.mrf.mxu2 }
 0x77d   :  { %v1412_v55 = vpop.f32.mrf.mxu3  ;;  %v1399_v56 = vadd.f32 %v1933_v54, %v1398_v53 }
 0x77f   :  { %v1413_v58 = vadd.f32 %v1412_v55, %v1399_v56 }
 0x781   :  { %v1417_v62 = vadd.f32 %v1413_v58, %v2181_v38 }
 0x784   :  { %v1400_v57 = vpop.f32.mrf.mxu2 }
 0x785   :  { %v1401_v59 = vadd.f32 %v1933_v54, %v1400_v57  ;;  %v1414_v60 = vpop.f32.mrf.mxu3 }
 0x787   :  { %v1415_v61 = vadd.f32 %v1414_v60, %v1401_v59 }
 0x789   :  { %v1418_v63 = vadd.f32 %v1415_v61, %v2185_v10 }
 0x78b   :  { %v1427_v0 = vpack.c.bf16 %v1418_v63, %v1417_v62 }
 0x78d   :  { %1814 = vmatmul.msk.bf16.vlgmr.msra.gmra.mxu0 %vm489_vm10, %v1427_v0 }
 0x80a   :  { %v1468_v4 = vpop.f32.mrf.mxu0 }
 0x80b   :  { %v1469_v5 = vadd.f32 %v1934_v3, %v1468_v4 }
 0x80d   :  { %1473 = vst.msk [vmem:[%s1515_s3] sm:$0xff] %vm163_vm1, %v1469_v5 }
 0x812   :  { %v1470_v29 = vpop.f32.mrf.mxu0 }
 0x813   :  { %v1471_v7 = vadd.f32 %v1934_v3, %v1470_v29 }
 0x815   :  { %1474 = vst.msk [vmem:[%s1515_s3 + $0x8] sm:$0xff] %vm163_vm1, %v1471_v7 }

</bundles_post_ra>
